<compile_context>
chip_gen: v5e
topology: v5e:2x2
jax: 0.10.0
libtpu: 0.0.40
codegen_flags: <defaults>
</compile_context>

<pallas_src>
import functools

import jax
import jax.numpy as jnp
from jax import lax
from jax.experimental import pallas as pl
from jax.experimental.pallas import tpu as pltpu


def _round_up(x, m):
    return ((x + m - 1) // m) * m


# ---------------------------------------------------------------------------
# Tiled matmul + bias (bf16 MXU operands, f32 accumulation)
# ---------------------------------------------------------------------------
def _matmul_bias_kernel(a_ref, w_ref, b_ref, o_ref, acc_ref):
    @pl.when(pl.program_id(2) == 0)
    def _():
        acc_ref[...] = jnp.zeros_like(acc_ref)

    acc_ref[...] += jnp.dot(a_ref[...], w_ref[...],
                            preferred_element_type=jnp.float32)

    @pl.when(pl.program_id(2) == pl.num_programs(2) - 1)
    def _():
        o_ref[...] = (acc_ref[...] + b_ref[...]).astype(o_ref.dtype)


def matmul_bias(a, w, bias, *, tm=256, tn=256, tk=512):
    """out[M, N] = a[M, K] @ w[K, N] + bias[N]  (f32 out, bf16 MXU feed)."""
    M, K = a.shape
    K2, N = w.shape
    assert K == K2
    # Clamp tiles to the (padded) problem size; keep (8, 128) alignment.
    tm = min(tm, _round_up(M, 8))
    tn = min(tn, _round_up(N, 128))
    tk = min(tk, _round_up(K, 128))
    Mp, Kp, Np = _round_up(M, tm), _round_up(K, tk), _round_up(N, tn)

    a_p = a.astype(jnp.bfloat16)
    w_p = w.astype(jnp.bfloat16)
    if (Mp, Kp) != (M, K):
        a_p = jnp.pad(a_p, ((0, Mp - M), (0, Kp - K)))
    if (Kp, Np) != (K, N):
        w_p = jnp.pad(w_p, ((0, Kp - K), (0, Np - N)))
    b_p = bias.astype(jnp.float32).reshape(1, N)
    if Np != N:
        b_p = jnp.pad(b_p, ((0, 0), (0, Np - N)))

    out = pl.pallas_call(
        _matmul_bias_kernel,
        out_shape=jax.ShapeDtypeStruct((Mp, Np), jnp.float32),
        grid_spec=pltpu.PrefetchScalarGridSpec(
            num_scalar_prefetch=0,
            grid=(Mp // tm, Np // tn, Kp // tk),
            in_specs=[
                pl.BlockSpec((tm, tk), lambda i, j, k: (i, k)),
                pl.BlockSpec((tk, tn), lambda i, j, k: (k, j)),
                pl.BlockSpec((1, tn), lambda i, j, k: (0, j)),
            ],
            out_specs=pl.BlockSpec((tm, tn), lambda i, j, k: (i, j)),
            scratch_shapes=[pltpu.VMEM((tm, tn), jnp.float32)],
        ),
        compiler_params=pltpu.CompilerParams(
            dimension_semantics=("parallel", "parallel", "arbitrary"),
            vmem_limit_bytes=32 * 1024 * 1024,
        ),
    )(a_p, w_p, b_p)
    if (Mp, Np) != (M, N):
        out = out[:M, :N]
    return out


# ---------------------------------------------------------------------------
# Fused [mean-token prepend + positional embedding add]
# ---------------------------------------------------------------------------
def _build_seq_kernel(t_ref, pos_ref, o_ref):
    t = t_ref[0]                                   # (HW, C)
    mean = jnp.mean(t, axis=0, keepdims=True)      # (1, C)
    seq = jnp.concatenate([mean, t], axis=0)       # (S, C)
    o_ref[0] = seq + pos_ref[...]                  # single full-block store


def build_seq(tokens, pos_emb):
    B, HW, C = tokens.shape
    S = HW + 1
    assert pos_emb.shape == (S, C)
    return pl.pallas_call(
        _build_seq_kernel,
        out_shape=jax.ShapeDtypeStruct((B, S, C), jnp.float32),
        grid=(B,),
        in_specs=[
            pl.BlockSpec((1, HW, C), lambda b: (b, 0, 0)),
            pl.BlockSpec((S, C), lambda b: (0, 0)),
        ],
        out_specs=pl.BlockSpec((1, S, C), lambda b: (b, 0, 0)),
        compiler_params=pltpu.CompilerParams(
            dimension_semantics=("parallel",)),
    )(tokens.astype(jnp.float32), pos_emb.astype(jnp.float32))


# ---------------------------------------------------------------------------
# Single-query multi-head attention (one program per batch element)
# ---------------------------------------------------------------------------
def _attn_pool_kernel(q_ref, k_ref, v_ref, o_ref, *, heads, scale):
    q = q_ref[0]                                   # (1, C)
    k = k_ref[0]                                   # (S, C)
    v = v_ref[0]                                   # (S, C)
    hd = q.shape[-1] // heads
    outs = []
    for h in range(heads):                         # static, unrolled
        sl = slice(h * hd, (h + 1) * hd)
        qh = q[:, sl] * scale                      # (1, hd)
        s = lax.dot_general(qh, k[:, sl], (((1,), (1,)), ((), ())),
                            preferred_element_type=jnp.float32)   # (1, S)
        s = s - jnp.max(s, axis=-1, keepdims=True)
        p = jnp.exp(s)
        p = p * pl.reciprocal(jnp.sum(p, axis=-1, keepdims=True), approx=True)
        outs.append(lax.dot_general(p, v[:, sl], (((1,), (0,)), ((), ())),
                                    preferred_element_type=jnp.float32))
    # Single lane-dense store of all heads.
    o_ref[0] = jnp.concatenate(outs, axis=-1).astype(o_ref.dtype)


def attn_pool(q, k, v, *, heads, scale):
    B, S, C = k.shape
    kernel = functools.partial(_attn_pool_kernel, heads=heads, scale=scale)
    out = pl.pallas_call(
        kernel,
        out_shape=jax.ShapeDtypeStruct((B, 1, C), jnp.float32),
        grid=(B,),
        in_specs=[
            pl.BlockSpec((1, 1, C), lambda b: (b, 0, 0)),
            pl.BlockSpec((1, S, C), lambda b: (b, 0, 0)),
            pl.BlockSpec((1, S, C), lambda b: (b, 0, 0)),
        ],
        out_specs=pl.BlockSpec((1, 1, C), lambda b: (b, 0, 0)),
        compiler_params=pltpu.CompilerParams(
            dimension_semantics=("parallel",)),
    )(q.reshape(B, 1, C), k, v)
    return out.reshape(B, C)


# ---------------------------------------------------------------------------
# Forward pass (matches AttentionPool2d.forward)
# ---------------------------------------------------------------------------
@functools.partial(jax.jit, static_argnames=("num_heads",))
def attention_pool_2d(x, params, num_heads):
    B, C, H, W = x.shape
    HW = H * W
    S = HW + 1
    # (B, C, H, W) -> (B, HW, C): channels-last tokens (single layout change).
    tokens = jnp.transpose(x.reshape(B, C, HW), (0, 2, 1)).astype(jnp.float32)
    seq = build_seq(tokens, params["pos_emb"])              # (B, S, C)

    q_in = seq[:, 0, :]                                     # only token 0 needs q
    kv_in = seq.reshape(B * S, C)
    q = matmul_bias(q_in, params["q_w"], params["q_b"])     # (B, C)
    k = matmul_bias(kv_in, params["k_w"], params["k_b"]).reshape(B, S, C)
    v = matmul_bias(kv_in, params["v_w"], params["v_b"]).reshape(B, S, C)

    hd = C // num_heads
    pooled = attn_pool(q, k, v, heads=num_heads, scale=hd ** -0.5)   # (B, C)
    return matmul_bias(pooled, params["c_w"], params["c_b"])         # (B, out)


# Pure-JAX reference (f32) for a numerical sanity check.
def attention_pool_2d_ref(x, params, num_heads):
    B, C, H, W = x.shape
    HW = H * W
    tokens = jnp.transpose(x.reshape(B, C, HW), (0, 2, 1))
    seq = jnp.concatenate([tokens.mean(axis=1, keepdims=True), tokens], axis=1)
    seq = seq + params["pos_emb"][None]
    q = seq[:, :1] @ params["q_w"] + params["q_b"]
    k = seq @ params["k_w"] + params["k_b"]
    v = seq @ params["v_w"] + params["v_b"]
    hd = C // num_heads
    qh = q.reshape(B, 1, num_heads, hd).transpose(0, 2, 1, 3) * hd ** -0.5
    kh = k.reshape(B, -1, num_heads, hd).transpose(0, 2, 1, 3)
    vh = v.reshape(B, -1, num_heads, hd).transpose(0, 2, 1, 3)
    p = jax.nn.softmax(jnp.einsum("bhqd,bhkd->bhqk", qh, kh), axis=-1)
    o = jnp.einsum("bhqk,bhkd->bhqd", p, vh).transpose(0, 2, 1, 3).reshape(B, C)
    return o @ params["c_w"] + params["c_b"]


def make_params(key, spacial_dim, embed_dim, num_heads, output_dim):
    ks = jax.random.split(key, 9)

    def lin(kw, kb, cin, cout):
        return (jax.random.normal(kw, (cin, cout), jnp.float32) * cin ** -0.5,
                0.02 * jax.random.normal(kb, (cout,), jnp.float32))

    q_w, q_b = lin(ks[0], ks[1], embed_dim, embed_dim)
    k_w, k_b = lin(ks[2], ks[3], embed_dim, embed_dim)
    v_w, v_b = lin(ks[4], ks[5], embed_dim, embed_dim)
    c_w, c_b = lin(ks[6], ks[7], embed_dim, output_dim)
    pos = jax.random.normal(ks[8], (spacial_dim ** 2 + 1, embed_dim),
                            jnp.float32) / embed_dim ** 0.5
    return dict(pos_emb=pos, q_w=q_w, q_b=q_b, k_w=k_w, k_b=k_b,
                v_w=v_w, v_b=v_b, c_w=c_w, c_b=c_b)


if __name__ == "__main__":
    batch = 2
    embed_dim = 256
    num_heads = 4
    output_dim = 128
    spacial_dim = 7            # -> 49 spatial tokens + 1 mean token

    key = jax.random.PRNGKey(0)
    pkey, xkey = jax.random.split(key)
    params = make_params(pkey, spacial_dim, embed_dim, num_heads, output_dim)
    x = jax.random.normal(xkey, (batch, embed_dim, spacial_dim, spacial_dim),
                          jnp.float32)

    out = attention_pool_2d(x, params, num_heads=num_heads)
    out = jax.block_until_ready(out)
    assert out.shape == (batch, output_dim), out.shape
    assert bool(jnp.all(jnp.isfinite(out)))

    ref = attention_pool_2d_ref(x, params, num_heads)
    max_err = float(jnp.max(jnp.abs(out - ref)))
    assert max_err < 0.1, max_err   # bf16 MXU feed with f32 accumulation
    print("KERNEL_OK")
</pallas_src>

<mosaic_0001>
module attributes {stable_mosaic.version = 11 : i64} {
  func.func @_matmul_bias_kernel(%arg0: i32, %arg1: i32, %arg2: i32, %arg3: memref<8x256xbf16, #tpu.memory_space<vmem>>, %arg4: memref<256x256xbf16, #tpu.memory_space<vmem>>, %arg5: memref<1x256xf32, #tpu.memory_space<vmem>>, %arg6: memref<8x256xf32, #tpu.memory_space<vmem>>, %arg7: memref<8x256xf32, #tpu.memory_space<vmem>>) attributes {dimension_semantics = [#tpu.dimension_semantics<parallel>, #tpu.dimension_semantics<parallel>, #tpu.dimension_semantics<arbitrary>], iteration_bounds = array<i64: 1, 1, 1>, scalar_prefetch = 0 : i64, scratch_operands = 1 : i64, tpu.core_type = #tpu.core_type<tc>, window_params = [{transform_indices = @transform_0, window_bounds = array<i64: 8, 256>}, {transform_indices = @transform_1, window_bounds = array<i64: 256, 256>}, {transform_indices = @transform_2, window_bounds = array<i64: 1, 256>}, {transform_indices = @transform_3, window_bounds = array<i64: 8, 256>}]} {
    %c0_i32 = arith.constant 0 : i32
    %0 = arith.cmpi eq, %arg2, %c0_i32 : i32
    %1 = arith.extui %0 : i1 to i32
    %c0_i32_0 = arith.constant 0 : i32
    %2 = arith.cmpi ne, %1, %c0_i32_0 : i32
    scf.if %2 {
      %cst_10 = arith.constant 0.000000e+00 : f32
      %12 = vector.broadcast %cst_10 : f32 to vector<8x256xf32>
      %c0_11 = arith.constant 0 : index
      %c0_12 = arith.constant 0 : index
      %13 = vector.load %arg7[%c0_11, %c0_12] : memref<8x256xf32, #tpu.memory_space<vmem>>, vector<8x256xf32>
      tpu.vector_store %arg7[%c0_11, %c0_12], %12 {strides = array<i32>} : memref<8x256xf32, #tpu.memory_space<vmem>>, vector<8x256xf32>,
    } else {
    }
    %c0 = arith.constant 0 : index
    %c0_1 = arith.constant 0 : index
    %3 = vector.load %arg7[%c0, %c0_1] : memref<8x256xf32, #tpu.memory_space<vmem>>, vector<8x256xf32>
    %c0_2 = arith.constant 0 : index
    %c0_3 = arith.constant 0 : index
    %4 = vector.load %arg3[%c0_2, %c0_3] : memref<8x256xbf16, #tpu.memory_space<vmem>>, vector<8x256xbf16>
    %c0_4 = arith.constant 0 : index
    %c0_5 = arith.constant 0 : index
    %5 = vector.load %arg4[%c0_4, %c0_5] : memref<256x256xbf16, #tpu.memory_space<vmem>>, vector<256x256xbf16>
    %cst = arith.constant dense<0.000000e+00> : vector<8x256xf32>
    %6 = tpu.matmul %4, %5, %cst {dimension_numbers = #tpu.dot_dimension_numbers<[1], [0], [0], [1], [0, 0, 1, 1], [], []>} : vector<8x256xbf16>, vector<256x256xbf16>, vector<8x256xf32> -> vector<8x256xf32>
    %7 = arith.addf %3, %6 : vector<8x256xf32>
    %c0_6 = arith.constant 0 : index
    %c0_7 = arith.constant 0 : index
    %8 = vector.load %arg7[%c0_6, %c0_7] : memref<8x256xf32, #tpu.memory_space<vmem>>, vector<8x256xf32>
    tpu.vector_store %arg7[%c0_6, %c0_7], %7 {strides = array<i32>} : memref<8x256xf32, #tpu.memory_space<vmem>>, vector<8x256xf32>,
    %c0_i32_8 = arith.constant 0 : i32
    %9 = arith.cmpi eq, %arg2, %c0_i32_8 : i32
    %10 = arith.extui %9 : i1 to i32
    %c0_i32_9 = arith.constant 0 : i32
    %11 = arith.cmpi ne, %10, %c0_i32_9 : i32
    scf.if %11 {
      %c0_10 = arith.constant 0 : index
      %c0_11 = arith.constant 0 : index
      %12 = vector.load %arg7[%c0_10, %c0_11] : memref<8x256xf32, #tpu.memory_space<vmem>>, vector<8x256xf32>
      %c0_12 = arith.constant 0 : index
      %c0_13 = arith.constant 0 : index
      %13 = vector.load %arg5[%c0_12, %c0_13] : memref<1x256xf32, #tpu.memory_space<vmem>>, vector<1x256xf32>
      %14 = vector.broadcast %13 : vector<1x256xf32> to vector<8x256xf32>
      %15 = arith.addf %12, %14 : vector<8x256xf32>
      %c0_14 = arith.constant 0 : index
      %c0_15 = arith.constant 0 : index
      %16 = vector.load %arg6[%c0_14, %c0_15] : memref<8x256xf32, #tpu.memory_space<vmem>>, vector<8x256xf32>
      tpu.vector_store %arg6[%c0_14, %c0_15], %15 {strides = array<i32>} : memref<8x256xf32, #tpu.memory_space<vmem>>, vector<8x256xf32>,
    } else {
    }
    return
  }
  func.func @transform_0(%arg0: i32, %arg1: i32, %arg2: i32) -> (i32, i32) {
    %c0_i32 = arith.constant 0 : i32
    return %arg0, %arg2 : i32, i32
  }
  func.func @transform_1(%arg0: i32, %arg1: i32, %arg2: i32) -> (i32, i32) {
    %c0_i32 = arith.constant 0 : i32
    return %arg2, %arg1 : i32, i32
  }
  func.func @transform_2(%arg0: i32, %arg1: i32, %arg2: i32) -> (i32, i32) {
    %c0_i32 = arith.constant 0 : i32
    %c0_i32_0 = arith.constant 0 : i32
    return %c0_i32, %arg1 : i32, i32
  }
  func.func @transform_3(%arg0: i32, %arg1: i32, %arg2: i32) -> (i32, i32) {
    %c0_i32 = arith.constant 0 : i32
    return %arg0, %arg1 : i32, i32
  }
}

module attributes {stable_mosaic.version = 11 : i64} {
  func.func @_build_seq_kernel(%arg0: i32, %arg1: memref<1x49x256xf32, #tpu.memory_space<vmem>>, %arg2: memref<50x256xf32, #tpu.memory_space<vmem>>, %arg3: memref<1x50x256xf32, #tpu.memory_space<vmem>>) attributes {dimension_semantics = [#tpu.dimension_semantics<parallel>], iteration_bounds = array<i64: 2>, scalar_prefetch = 0 : i64, scratch_operands = 0 : i64, tpu.core_type = #tpu.core_type<tc>, window_params = [{transform_indices = @transform_0, window_bounds = array<i64: 1, 49, 256>}, {pipeline_mode = #tpu.pipeline_mode<synchronous>, transform_indices = @transform_1, window_bounds = array<i64: 50, 256>}, {transform_indices = @transform_2, window_bounds = array<i64: 1, 50, 256>}]} {
    %c0 = arith.constant 0 : index
    %c0_0 = arith.constant 0 : index
    %c0_1 = arith.constant 0 : index
    %0 = vector.load %arg1[%c0, %c0_0, %c0_1] : memref<1x49x256xf32, #tpu.memory_space<vmem>>, vector<1x49x256xf32>
    %1 = vector.shape_cast %0 : vector<1x49x256xf32> to vector<49x256xf32>
    %cst = arith.constant dense<0.000000e+00> : vector<256xf32>
    %2 = vector.multi_reduction <add>, %1, %cst [0] : vector<49x256xf32> to vector<256xf32>
    %3 = vector.shape_cast %2 : vector<256xf32> to vector<1x256xf32>
    %cst_2 = arith.constant 4.900000e+01 : f32
    %4 = vector.broadcast %cst_2 : f32 to vector<1x256xf32>
    %5 = arith.divf %3, %4 : vector<1x256xf32>
    %6 = tpu.concatenate %5, %1 in 0 : vector<1x256xf32>, vector<49x256xf32> -> vector<50x256xf32>
    %c0_3 = arith.constant 0 : index
    %c0_4 = arith.constant 0 : index
    %7 = vector.load %arg2[%c0_3, %c0_4] : memref<50x256xf32, #tpu.memory_space<vmem>>, vector<50x256xf32>
    %8 = arith.addf %6, %7 : vector<50x256xf32>
    %c0_5 = arith.constant 0 : index
    %c0_6 = arith.constant 0 : index
    %c0_7 = arith.constant 0 : index
    %9 = vector.load %arg3[%c0_5, %c0_6, %c0_7] : memref<1x50x256xf32, #tpu.memory_space<vmem>>, vector<1x50x256xf32>
    %10 = vector.shape_cast %9 : vector<1x50x256xf32> to vector<50x256xf32>
    %11 = vector.shape_cast %8 : vector<50x256xf32> to vector<1x50x256xf32>
    tpu.vector_store %arg3[%c0_5, %c0_6, %c0_7], %11 {strides = array<i32>} : memref<1x50x256xf32, #tpu.memory_space<vmem>>, vector<1x50x256xf32>,
    return
  }
  func.func @transform_0(%arg0: i32) -> (i32, i32, i32) {
    %c0_i32 = arith.constant 0 : i32
    %c0_i32_0 = arith.constant 0 : i32
    %c0_i32_1 = arith.constant 0 : i32
    return %arg0, %c0_i32, %c0_i32_0 : i32, i32, i32
  }
  func.func @transform_1(%arg0: i32) -> (i32, i32) {
    %c0_i32 = arith.constant 0 : i32
    %c0_i32_0 = arith.constant 0 : i32
    %c0_i32_1 = arith.constant 0 : i32
    return %c0_i32, %c0_i32_0 : i32, i32
  }
  func.func @transform_2(%arg0: i32) -> (i32, i32, i32) {
    %c0_i32 = arith.constant 0 : i32
    %c0_i32_0 = arith.constant 0 : i32
    %c0_i32_1 = arith.constant 0 : i32
    return %arg0, %c0_i32, %c0_i32_0 : i32, i32, i32
  }
}

module attributes {stable_mosaic.version = 11 : i64} {
  func.func @_matmul_bias_kernel(%arg0: i32, %arg1: i32, %arg2: i32, %arg3: memref<104x256xbf16, #tpu.memory_space<vmem>>, %arg4: memref<256x256xbf16, #tpu.memory_space<vmem>>, %arg5: memref<1x256xf32, #tpu.memory_space<vmem>>, %arg6: memref<104x256xf32, #tpu.memory_space<vmem>>, %arg7: memref<104x256xf32, #tpu.memory_space<vmem>>) attributes {dimension_semantics = [#tpu.dimension_semantics<parallel>, #tpu.dimension_semantics<parallel>, #tpu.dimension_semantics<arbitrary>], iteration_bounds = array<i64: 1, 1, 1>, scalar_prefetch = 0 : i64, scratch_operands = 1 : i64, tpu.core_type = #tpu.core_type<tc>, window_params = [{transform_indices = @transform_0, window_bounds = array<i64: 104, 256>}, {transform_indices = @transform_1, window_bounds = array<i64: 256, 256>}, {transform_indices = @transform_2, window_bounds = array<i64: 1, 256>}, {transform_indices = @transform_3, window_bounds = array<i64: 104, 256>}]} {
    %c0_i32 = arith.constant 0 : i32
    %0 = arith.cmpi eq, %arg2, %c0_i32 : i32
    %1 = arith.extui %0 : i1 to i32
    %c0_i32_0 = arith.constant 0 : i32
    %2 = arith.cmpi ne, %1, %c0_i32_0 : i32
    scf.if %2 {
      %cst_10 = arith.constant 0.000000e+00 : f32
      %12 = vector.broadcast %cst_10 : f32 to vector<104x256xf32>
      %c0_11 = arith.constant 0 : index
      %c0_12 = arith.constant 0 : index
      %13 = vector.load %arg7[%c0_11, %c0_12] : memref<104x256xf32, #tpu.memory_space<vmem>>, vector<104x256xf32>
      tpu.vector_store %arg7[%c0_11, %c0_12], %12 {strides = array<i32>} : memref<104x256xf32, #tpu.memory_space<vmem>>, vector<104x256xf32>,
    } else {
    }
    %c0 = arith.constant 0 : index
    %c0_1 = arith.constant 0 : index
    %3 = vector.load %arg7[%c0, %c0_1] : memref<104x256xf32, #tpu.memory_space<vmem>>, vector<104x256xf32>
    %c0_2 = arith.constant 0 : index
    %c0_3 = arith.constant 0 : index
    %4 = vector.load %arg3[%c0_2, %c0_3] : memref<104x256xbf16, #tpu.memory_space<vmem>>, vector<104x256xbf16>
    %c0_4 = arith.constant 0 : index
    %c0_5 = arith.constant 0 : index
    %5 = vector.load %arg4[%c0_4, %c0_5] : memref<256x256xbf16, #tpu.memory_space<vmem>>, vector<256x256xbf16>
    %cst = arith.constant dense<0.000000e+00> : vector<104x256xf32>
    %6 = tpu.matmul %4, %5, %cst {dimension_numbers = #tpu.dot_dimension_numbers<[1], [0], [0], [1], [0, 0, 1, 1], [], []>} : vector<104x256xbf16>, vector<256x256xbf16>, vector<104x256xf32> -> vector<104x256xf32>
    %7 = arith.addf %3, %6 : vector<104x256xf32>
    %c0_6 = arith.constant 0 : index
    %c0_7 = arith.constant 0 : index
    %8 = vector.load %arg7[%c0_6, %c0_7] : memref<104x256xf32, #tpu.memory_space<vmem>>, vector<104x256xf32>
    tpu.vector_store %arg7[%c0_6, %c0_7], %7 {strides = array<i32>} : memref<104x256xf32, #tpu.memory_space<vmem>>, vector<104x256xf32>,
    %c0_i32_8 = arith.constant 0 : i32
    %9 = arith.cmpi eq, %arg2, %c0_i32_8 : i32
    %10 = arith.extui %9 : i1 to i32
    %c0_i32_9 = arith.constant 0 : i32
    %11 = arith.cmpi ne, %10, %c0_i32_9 : i32
    scf.if %11 {
      %c0_10 = arith.constant 0 : index
      %c0_11 = arith.constant 0 : index
      %12 = vector.load %arg7[%c0_10, %c0_11] : memref<104x256xf32, #tpu.memory_space<vmem>>, vector<104x256xf32>
      %c0_12 = arith.constant 0 : index
      %c0_13 = arith.constant 0 : index
      %13 = vector.load %arg5[%c0_12, %c0_13] : memref<1x256xf32, #tpu.memory_space<vmem>>, vector<1x256xf32>
      %14 = vector.broadcast %13 : vector<1x256xf32> to vector<104x256xf32>
      %15 = arith.addf %12, %14 : vector<104x256xf32>
      %c0_14 = arith.constant 0 : index
      %c0_15 = arith.constant 0 : index
      %16 = vector.load %arg6[%c0_14, %c0_15] : memref<104x256xf32, #tpu.memory_space<vmem>>, vector<104x256xf32>
      tpu.vector_store %arg6[%c0_14, %c0_15], %15 {strides = array<i32>} : memref<104x256xf32, #tpu.memory_space<vmem>>, vector<104x256xf32>,
    } else {
    }
    return
  }
  func.func @transform_0(%arg0: i32, %arg1: i32, %arg2: i32) -> (i32, i32) {
    %c0_i32 = arith.constant 0 : i32
    return %arg0, %arg2 : i32, i32
  }
  func.func @transform_1(%arg0: i32, %arg1: i32, %arg2: i32) -> (i32, i32) {
    %c0_i32 = arith.constant 0 : i32
    return %arg2, %arg1 : i32, i32
  }
  func.func @transform_2(%arg0: i32, %arg1: i32, %arg2: i32) -> (i32, i32) {
    %c0_i32 = arith.constant 0 : i32
    %c0_i32_0 = arith.constant 0 : i32
    return %c0_i32, %arg1 : i32, i32
  }
  func.func @transform_3(%arg0: i32, %arg1: i32, %arg2: i32) -> (i32, i32) {
    %c0_i32 = arith.constant 0 : i32
    return %arg0, %arg1 : i32, i32
  }
}

module attributes {stable_mosaic.version = 11 : i64} {
  func.func @_attn_pool_kernel(%arg0: i32, %arg1: memref<1x1x256xf32, #tpu.memory_space<vmem>>, %arg2: memref<1x50x256xf32, #tpu.memory_space<vmem>>, %arg3: memref<1x50x256xf32, #tpu.memory_space<vmem>>, %arg4: memref<1x1x256xf32, #tpu.memory_space<vmem>>) attributes {dimension_semantics = [#tpu.dimension_semantics<parallel>], iteration_bounds = array<i64: 2>, scalar_prefetch = 0 : i64, scratch_operands = 0 : i64, tpu.core_type = #tpu.core_type<tc>, window_params = [{transform_indices = @transform_0, window_bounds = array<i64: 1, 1, 256>}, {transform_indices = @transform_1, window_bounds = array<i64: 1, 50, 256>}, {transform_indices = @transform_2, window_bounds = array<i64: 1, 50, 256>}, {transform_indices = @transform_3, window_bounds = array<i64: 1, 1, 256>}]} {
    %c0 = arith.constant 0 : index
    %c0_0 = arith.constant 0 : index
    %c0_1 = arith.constant 0 : index
    %0 = vector.load %arg1[%c0, %c0_0, %c0_1] : memref<1x1x256xf32, #tpu.memory_space<vmem>>, vector<1x1x256xf32>
    %1 = vector.shape_cast %0 : vector<1x1x256xf32> to vector<1x256xf32>
    %c0_2 = arith.constant 0 : index
    %c0_3 = arith.constant 0 : index
    %c0_4 = arith.constant 0 : index
    %2 = vector.load %arg2[%c0_2, %c0_3, %c0_4] : memref<1x50x256xf32, #tpu.memory_space<vmem>>, vector<1x50x256xf32>
    %3 = vector.shape_cast %2 : vector<1x50x256xf32> to vector<50x256xf32>
    %c0_5 = arith.constant 0 : index
    %c0_6 = arith.constant 0 : index
    %c0_7 = arith.constant 0 : index
    %4 = vector.load %arg3[%c0_5, %c0_6, %c0_7] : memref<1x50x256xf32, #tpu.memory_space<vmem>>, vector<1x50x256xf32>
    %5 = vector.shape_cast %4 : vector<1x50x256xf32> to vector<50x256xf32>
    %6 = vector.extract_strided_slice %1 {offsets = [0, 0], sizes = [1, 64], strides = [1, 1]} : vector<1x256xf32> to vector<1x64xf32>
    %cst = arith.constant 1.250000e-01 : f32
    %7 = vector.broadcast %cst : f32 to vector<1x64xf32>
    %8 = arith.mulf %6, %7 : vector<1x64xf32>
    %9 = vector.extract_strided_slice %3 {offsets = [0, 0], sizes = [50, 64], strides = [1, 1]} : vector<50x256xf32> to vector<50x64xf32>
    %cst_8 = arith.constant dense<0.000000e+00> : vector<1x50xf32>
    %10 = tpu.matmul %8, %9, %cst_8 {dimension_numbers = #tpu.dot_dimension_numbers<[1], [1], [0], [0], [0, 0, 1, 0], [], []>} : vector<1x64xf32>, vector<50x64xf32>, vector<1x50xf32> -> vector<1x50xf32>
    %cst_9 = arith.constant dense<0xFF800000> : vector<1xf32>
    %11 = vector.multi_reduction <maximumf>, %10, %cst_9 [1] : vector<1x50xf32> to vector<1xf32>
    %12 = vector.shape_cast %11 : vector<1xf32> to vector<1x1xf32>
    %13 = vector.broadcast %12 : vector<1x1xf32> to vector<1x50xf32>
    %14 = arith.subf %10, %13 : vector<1x50xf32>
    %15 = math.exp %14 : vector<1x50xf32>
    %cst_10 = arith.constant dense<0.000000e+00> : vector<1xf32>
    %16 = vector.multi_reduction <add>, %15, %cst_10 [1] : vector<1x50xf32> to vector<1xf32>
    %17 = vector.shape_cast %16 : vector<1xf32> to vector<1x1xf32>
    %18 = tpu.reciprocal %17 {approx = true} : vector<1x1xf32> -> vector<1x1xf32>
    %19 = vector.broadcast %18 : vector<1x1xf32> to vector<1x50xf32>
    %20 = arith.mulf %15, %19 : vector<1x50xf32>
    %21 = vector.extract_strided_slice %5 {offsets = [0, 0], sizes = [50, 64], strides = [1, 1]} : vector<50x256xf32> to vector<50x64xf32>
    %cst_11 = arith.constant dense<0.000000e+00> : vector<1x64xf32>
    %22 = tpu.matmul %20, %21, %cst_11 {dimension_numbers = #tpu.dot_dimension_numbers<[1], [0], [0], [1], [0, 0, 1, 1], [], []>} : vector<1x50xf32>, vector<50x64xf32>, vector<1x64xf32> -> vector<1x64xf32>
    %23 = vector.extract_strided_slice %1 {offsets = [0, 64], sizes = [1, 64], strides = [1, 1]} : vector<1x256xf32> to vector<1x64xf32>
    %cst_12 = arith.constant 1.250000e-01 : f32
    %24 = vector.broadcast %cst_12 : f32 to vector<1x64xf32>
    %25 = arith.mulf %23, %24 : vector<1x64xf32>
    %26 = vector.extract_strided_slice %3 {offsets = [0, 64], sizes = [50, 64], strides = [1, 1]} : vector<50x256xf32> to vector<50x64xf32>
    %cst_13 = arith.constant dense<0.000000e+00> : vector<1x50xf32>
    %27 = tpu.matmul %25, %26, %cst_13 {dimension_numbers = #tpu.dot_dimension_numbers<[1], [1], [0], [0], [0, 0, 1, 0], [], []>} : vector<1x64xf32>, vector<50x64xf32>, vector<1x50xf32> -> vector<1x50xf32>
    %cst_14 = arith.constant dense<0xFF800000> : vector<1xf32>
    %28 = vector.multi_reduction <maximumf>, %27, %cst_14 [1] : vector<1x50xf32> to vector<1xf32>
    %29 = vector.shape_cast %28 : vector<1xf32> to vector<1x1xf32>
    %30 = vector.broadcast %29 : vector<1x1xf32> to vector<1x50xf32>
    %31 = arith.subf %27, %30 : vector<1x50xf32>
    %32 = math.exp %31 : vector<1x50xf32>
    %cst_15 = arith.constant dense<0.000000e+00> : vector<1xf32>
    %33 = vector.multi_reduction <add>, %32, %cst_15 [1] : vector<1x50xf32> to vector<1xf32>
    %34 = vector.shape_cast %33 : vector<1xf32> to vector<1x1xf32>
    %35 = tpu.reciprocal %34 {approx = true} : vector<1x1xf32> -> vector<1x1xf32>
    %36 = vector.broadcast %35 : vector<1x1xf32> to vector<1x50xf32>
    %37 = arith.mulf %32, %36 : vector<1x50xf32>
    %38 = vector.extract_strided_slice %5 {offsets = [0, 64], sizes = [50, 64], strides = [1, 1]} : vector<50x256xf32> to vector<50x64xf32>
    %cst_16 = arith.constant dense<0.000000e+00> : vector<1x64xf32>
    %39 = tpu.matmul %37, %38, %cst_16 {dimension_numbers = #tpu.dot_dimension_numbers<[1], [0], [0], [1], [0, 0, 1, 1], [], []>} : vector<1x50xf32>, vector<50x64xf32>, vector<1x64xf32> -> vector<1x64xf32>
    %40 = vector.extract_strided_slice %1 {offsets = [0, 128], sizes = [1, 64], strides = [1, 1]} : vector<1x256xf32> to vector<1x64xf32>
    %cst_17 = arith.constant 1.250000e-01 : f32
    %41 = vector.broadcast %cst_17 : f32 to vector<1x64xf32>
    %42 = arith.mulf %40, %41 : vector<1x64xf32>
    %43 = vector.extract_strided_slice %3 {offsets = [0, 128], sizes = [50, 64], strides = [1, 1]} : vector<50x256xf32> to vector<50x64xf32>
    %cst_18 = arith.constant dense<0.000000e+00> : vector<1x50xf32>
    %44 = tpu.matmul %42, %43, %cst_18 {dimension_numbers = #tpu.dot_dimension_numbers<[1], [1], [0], [0], [0, 0, 1, 0], [], []>} : vector<1x64xf32>, vector<50x64xf32>, vector<1x50xf32> -> vector<1x50xf32>
    %cst_19 = arith.constant dense<0xFF800000> : vector<1xf32>
    %45 = vector.multi_reduction <maximumf>, %44, %cst_19 [1] : vector<1x50xf32> to vector<1xf32>
    %46 = vector.shape_cast %45 : vector<1xf32> to vector<1x1xf32>
    %47 = vector.broadcast %46 : vector<1x1xf32> to vector<1x50xf32>
    %48 = arith.subf %44, %47 : vector<1x50xf32>
    %49 = math.exp %48 : vector<1x50xf32>
    %cst_20 = arith.constant dense<0.000000e+00> : vector<1xf32>
    %50 = vector.multi_reduction <add>, %49, %cst_20 [1] : vector<1x50xf32> to vector<1xf32>
    %51 = vector.shape_cast %50 : vector<1xf32> to vector<1x1xf32>
    %52 = tpu.reciprocal %51 {approx = true} : vector<1x1xf32> -> vector<1x1xf32>
    %53 = vector.broadcast %52 : vector<1x1xf32> to vector<1x50xf32>
    %54 = arith.mulf %49, %53 : vector<1x50xf32>
    %55 = vector.extract_strided_slice %5 {offsets = [0, 128], sizes = [50, 64], strides = [1, 1]} : vector<50x256xf32> to vector<50x64xf32>
    %cst_21 = arith.constant dense<0.000000e+00> : vector<1x64xf32>
    %56 = tpu.matmul %54, %55, %cst_21 {dimension_numbers = #tpu.dot_dimension_numbers<[1], [0], [0], [1], [0, 0, 1, 1], [], []>} : vector<1x50xf32>, vector<50x64xf32>, vector<1x64xf32> -> vector<1x64xf32>
    %57 = vector.extract_strided_slice %1 {offsets = [0, 192], sizes = [1, 64], strides = [1, 1]} : vector<1x256xf32> to vector<1x64xf32>
    %cst_22 = arith.constant 1.250000e-01 : f32
    %58 = vector.broadcast %cst_22 : f32 to vector<1x64xf32>
    %59 = arith.mulf %57, %58 : vector<1x64xf32>
    %60 = vector.extract_strided_slice %3 {offsets = [0, 192], sizes = [50, 64], strides = [1, 1]} : vector<50x256xf32> to vector<50x64xf32>
    %cst_23 = arith.constant dense<0.000000e+00> : vector<1x50xf32>
    %61 = tpu.matmul %59, %60, %cst_23 {dimension_numbers = #tpu.dot_dimension_numbers<[1], [1], [0], [0], [0, 0, 1, 0], [], []>} : vector<1x64xf32>, vector<50x64xf32>, vector<1x50xf32> -> vector<1x50xf32>
    %cst_24 = arith.constant dense<0xFF800000> : vector<1xf32>
    %62 = vector.multi_reduction <maximumf>, %61, %cst_24 [1] : vector<1x50xf32> to vector<1xf32>
    %63 = vector.shape_cast %62 : vector<1xf32> to vector<1x1xf32>
    %64 = vector.broadcast %63 : vector<1x1xf32> to vector<1x50xf32>
    %65 = arith.subf %61, %64 : vector<1x50xf32>
    %66 = math.exp %65 : vector<1x50xf32>
    %cst_25 = arith.constant dense<0.000000e+00> : vector<1xf32>
    %67 = vector.multi_reduction <add>, %66, %cst_25 [1] : vector<1x50xf32> to vector<1xf32>
    %68 = vector.shape_cast %67 : vector<1xf32> to vector<1x1xf32>
    %69 = tpu.reciprocal %68 {approx = true} : vector<1x1xf32> -> vector<1x1xf32>
    %70 = vector.broadcast %69 : vector<1x1xf32> to vector<1x50xf32>
    %71 = arith.mulf %66, %70 : vector<1x50xf32>
    %72 = vector.extract_strided_slice %5 {offsets = [0, 192], sizes = [50, 64], strides = [1, 1]} : vector<50x256xf32> to vector<50x64xf32>
    %cst_26 = arith.constant dense<0.000000e+00> : vector<1x64xf32>
    %73 = tpu.matmul %71, %72, %cst_26 {dimension_numbers = #tpu.dot_dimension_numbers<[1], [0], [0], [1], [0, 0, 1, 1], [], []>} : vector<1x50xf32>, vector<50x64xf32>, vector<1x64xf32> -> vector<1x64xf32>
    %74 = tpu.concatenate %22, %39, %56, %73 in 1 : vector<1x64xf32>, vector<1x64xf32>, vector<1x64xf32>, vector<1x64xf32> -> vector<1x256xf32>
    %c0_27 = arith.constant 0 : index
    %c0_28 = arith.constant 0 : index
    %c0_29 = arith.constant 0 : index
    %75 = vector.load %arg4[%c0_27, %c0_28, %c0_29] : memref<1x1x256xf32, #tpu.memory_space<vmem>>, vector<1x1x256xf32>
    %76 = vector.shape_cast %75 : vector<1x1x256xf32> to vector<1x256xf32>
    %77 = vector.shape_cast %74 : vector<1x256xf32> to vector<1x1x256xf32>
    tpu.vector_store %arg4[%c0_27, %c0_28, %c0_29], %77 {strides = array<i32>} : memref<1x1x256xf32, #tpu.memory_space<vmem>>, vector<1x1x256xf32>,
    return
  }
  func.func @transform_0(%arg0: i32) -> (i32, i32, i32) {
    %c0_i32 = arith.constant 0 : i32
    %c0_i32_0 = arith.constant 0 : i32
    %c0_i32_1 = arith.constant 0 : i32
    return %arg0, %c0_i32, %c0_i32_0 : i32, i32, i32
  }
  func.func @transform_1(%arg0: i32) -> (i32, i32, i32) {
    %c0_i32 = arith.constant 0 : i32
    %c0_i32_0 = arith.constant 0 : i32
    %c0_i32_1 = arith.constant 0 : i32
    return %arg0, %c0_i32, %c0_i32_0 : i32, i32, i32
  }
  func.func @transform_2(%arg0: i32) -> (i32, i32, i32) {
    %c0_i32 = arith.constant 0 : i32
    %c0_i32_0 = arith.constant 0 : i32
    %c0_i32_1 = arith.constant 0 : i32
    return %arg0, %c0_i32, %c0_i32_0 : i32, i32, i32
  }
  func.func @transform_3(%arg0: i32) -> (i32, i32, i32) {
    %c0_i32 = arith.constant 0 : i32
    %c0_i32_0 = arith.constant 0 : i32
    %c0_i32_1 = arith.constant 0 : i32
    return %arg0, %c0_i32, %c0_i32_0 : i32, i32, i32
  }
}

module attributes {stable_mosaic.version = 11 : i64} {
  func.func @_matmul_bias_kernel(%arg0: i32, %arg1: i32, %arg2: i32, %arg3: memref<8x256xbf16, #tpu.memory_space<vmem>>, %arg4: memref<256x128xbf16, #tpu.memory_space<vmem>>, %arg5: memref<1x128xf32, #tpu.memory_space<vmem>>, %arg6: memref<8x128xf32, #tpu.memory_space<vmem>>, %arg7: memref<8x128xf32, #tpu.memory_space<vmem>>) attributes {dimension_semantics = [#tpu.dimension_semantics<parallel>, #tpu.dimension_semantics<parallel>, #tpu.dimension_semantics<arbitrary>], iteration_bounds = array<i64: 1, 1, 1>, scalar_prefetch = 0 : i64, scratch_operands = 1 : i64, tpu.core_type = #tpu.core_type<tc>, window_params = [{transform_indices = @transform_0, window_bounds = array<i64: 8, 256>}, {transform_indices = @transform_1, window_bounds = array<i64: 256, 128>}, {transform_indices = @transform_2, window_bounds = array<i64: 1, 128>}, {transform_indices = @transform_3, window_bounds = array<i64: 8, 128>}]} {
    %c0_i32 = arith.constant 0 : i32
    %0 = arith.cmpi eq, %arg2, %c0_i32 : i32
    %1 = arith.extui %0 : i1 to i32
    %c0_i32_0 = arith.constant 0 : i32
    %2 = arith.cmpi ne, %1, %c0_i32_0 : i32
    scf.if %2 {
      %cst_10 = arith.constant 0.000000e+00 : f32
      %12 = vector.broadcast %cst_10 : f32 to vector<8x128xf32>
      %c0_11 = arith.constant 0 : index
      %c0_12 = arith.constant 0 : index
      %13 = vector.load %arg7[%c0_11, %c0_12] : memref<8x128xf32, #tpu.memory_space<vmem>>, vector<8x128xf32>
      tpu.vector_store %arg7[%c0_11, %c0_12], %12 {strides = array<i32>} : memref<8x128xf32, #tpu.memory_space<vmem>>, vector<8x128xf32>,
    } else {
    }
    %c0 = arith.constant 0 : index
    %c0_1 = arith.constant 0 : index
    %3 = vector.load %arg7[%c0, %c0_1] : memref<8x128xf32, #tpu.memory_space<vmem>>, vector<8x128xf32>
    %c0_2 = arith.constant 0 : index
    %c0_3 = arith.constant 0 : index
    %4 = vector.load %arg3[%c0_2, %c0_3] : memref<8x256xbf16, #tpu.memory_space<vmem>>, vector<8x256xbf16>
    %c0_4 = arith.constant 0 : index
    %c0_5 = arith.constant 0 : index
    %5 = vector.load %arg4[%c0_4, %c0_5] : memref<256x128xbf16, #tpu.memory_space<vmem>>, vector<256x128xbf16>
    %cst = arith.constant dense<0.000000e+00> : vector<8x128xf32>
    %6 = tpu.matmul %4, %5, %cst {dimension_numbers = #tpu.dot_dimension_numbers<[1], [0], [0], [1], [0, 0, 1, 1], [], []>} : vector<8x256xbf16>, vector<256x128xbf16>, vector<8x128xf32> -> vector<8x128xf32>
    %7 = arith.addf %3, %6 : vector<8x128xf32>
    %c0_6 = arith.constant 0 : index
    %c0_7 = arith.constant 0 : index
    %8 = vector.load %arg7[%c0_6, %c0_7] : memref<8x128xf32, #tpu.memory_space<vmem>>, vector<8x128xf32>
    tpu.vector_store %arg7[%c0_6, %c0_7], %7 {strides = array<i32>} : memref<8x128xf32, #tpu.memory_space<vmem>>, vector<8x128xf32>,
    %c0_i32_8 = arith.constant 0 : i32
    %9 = arith.cmpi eq, %arg2, %c0_i32_8 : i32
    %10 = arith.extui %9 : i1 to i32
    %c0_i32_9 = arith.constant 0 : i32
    %11 = arith.cmpi ne, %10, %c0_i32_9 : i32
    scf.if %11 {
      %c0_10 = arith.constant 0 : index
      %c0_11 = arith.constant 0 : index
      %12 = vector.load %arg7[%c0_10, %c0_11] : memref<8x128xf32, #tpu.memory_space<vmem>>, vector<8x128xf32>
      %c0_12 = arith.constant 0 : index
      %c0_13 = arith.constant 0 : index
      %13 = vector.load %arg5[%c0_12, %c0_13] : memref<1x128xf32, #tpu.memory_space<vmem>>, vector<1x128xf32>
      %14 = vector.broadcast %13 : vector<1x128xf32> to vector<8x128xf32>
      %15 = arith.addf %12, %14 : vector<8x128xf32>
      %c0_14 = arith.constant 0 : index
      %c0_15 = arith.constant 0 : index
      %16 = vector.load %arg6[%c0_14, %c0_15] : memref<8x128xf32, #tpu.memory_space<vmem>>, vector<8x128xf32>
      tpu.vector_store %arg6[%c0_14, %c0_15], %15 {strides = array<i32>} : memref<8x128xf32, #tpu.memory_space<vmem>>, vector<8x128xf32>,
    } else {
    }
    return
  }
  func.func @transform_0(%arg0: i32, %arg1: i32, %arg2: i32) -> (i32, i32) {
    %c0_i32 = arith.constant 0 : i32
    return %arg0, %arg2 : i32, i32
  }
  func.func @transform_1(%arg0: i32, %arg1: i32, %arg2: i32) -> (i32, i32) {
    %c0_i32 = arith.constant 0 : i32
    return %arg2, %arg1 : i32, i32
  }
  func.func @transform_2(%arg0: i32, %arg1: i32, %arg2: i32) -> (i32, i32) {
    %c0_i32 = arith.constant 0 : i32
    %c0_i32_0 = arith.constant 0 : i32
    return %c0_i32, %arg1 : i32, i32
  }
  func.func @transform_3(%arg0: i32, %arg1: i32, %arg2: i32) -> (i32, i32) {
    %c0_i32 = arith.constant 0 : i32
    return %arg0, %arg1 : i32, i32
  }
}

</mosaic_0001>

<bundles_post_ra>
// kernel: attention_pool_2d.6
= control target key start
LH: loop header
LB: loop body
LE: loop exit
PB: predicated region body
PF: predicated region fallthrough
CT: control target
= control target key end

     0   :  { %7 = vsyncpa [#allocation3], 0  ;;  %s473_s9 = smov 0   ;;  %s587_s0 = inlined_call_operand.vmem [shape: f32[2,49,256], index: 0, kind: input, shape index: {}]   ;;  %s588_s1 = inlined_call_operand.hbm [shape: f32[50,256], index: 1, kind: input, shape index: {}]   ;;  %s589_s2 = inlined_call_operand.vmem [shape: f32[2,50,256], index: 2, kind: output, shape index: {}]  }
   0x1 LB: > { %s102_s12 = sshll.u32 %s588_s1, 4  ;;  %s376_s13 = sadd.s32 4294967295, %s452_s9   ;;  %s452_s9 = sphi %s473_s9, %s13_s9   ;;  %s103_s12 = int_to_ptr.hbm [resolvable:$true] %s102_s12 }
   0x2   : > { %p378_p0 = scmp.ge.s32.totalorder %s452_s9, 1  ;;  %p91_p1 = scmp.lt.s32.totalorder %s452_s9, 3 }
   0x3   : > { %p396_p2 = scmp.eq.s32.totalorder %s376_s13, 0  ;;  %s454_s14 = smov [#allocation2]  }
   0x4   : > { %p92_p3 = pnand %p378_p0, %p91_p1  ;;  %s104_s15 = sshll.u32 %s454_s14, 4  ;;  %s105_s15 = int_to_ptr.vmem [resolvable:$true] %s104_s15 }
   0x5   : > { %s455_s16 = smov 256   ;;  %s456_s17 = smov 16  }
   0x6   : > { %p392_p4 = pneg %p92_p3  ;;  %128 = sbr.rel (%p92_p3) target bundleno = 50 (0x32), region = 28 }
   0x8   : > { %p393_p5 = pnand %p396_p2, %p392_p4 }
   0xa   : > { %395 = dma.hbm_to_vmem [thread:$0]  (!%p393_p5), %s103_s12, 1792, %s105_s15, [#allocation3], %s455_s16, %s455_s16, %s456_s17  }
   0xb   : > { %447 = dma.done.wait (%p396_p2), [#allocation3], 1792  }
   0xc   : > { %449 = vsyncadd (%p396_p2), [#allocation3], 4294965504  ;;  %p151_p6 = scmp.lt.s32.totalorder %s376_s13, 1  ;;  %v457_v0 = vmov 49.0   ;;  %vm180_vm0 = vcmask 1040384   ;;  %v269_v28 = vld [vmem:[#allocation2 + $0x10] sm:$0xff] }
   0xd   : > { %410 = vrcp.f32 %v457_v0  ;;  %v270_v29 = vld [vmem:[#allocation2 + $0x18] sm:$0xff]  ;;  %v271_v34 = vld [vmem:[#allocation2 + $0x20] sm:$0xff]  ;;  %v272_v35 = vld [vmem:[#allocation2 + $0x28] sm:$0xff] }
   0xe   : > { %s591_s13 = smov (!%p151_p6, %s376_s13), 1  ;;  %v273_v37 = vld [vmem:[#allocation2 + $0x30] sm:$0xff]  ;;  %v274_v47 = vld [vmem:[#allocation2 + $0x38] sm:$0xff]  ;;  %v275_v56 = vld [vmem:[#allocation2 + $0x40] sm:$0xff] }
   0xf   : > { %s387_s18 = smul.u32 112, %s591_s13  ;;  %v276_v58 = vld [vmem:[#allocation2 + $0x48] sm:$0xff]  ;;  %v277_v62 = vld [vmem:[#allocation2 + $0x50] sm:$0xff] }
  0x11   : > { %s490_s21 = scalar_lea.vmem %s587_s0, %s387_s18  ;;  %s529_s24 = scalar_lea.vmem %s589_s2, %s387_s18 }
  0x12   : > { %v495_v2 = vld [vmem:[%s490_s21] sm:$0xff]  ;;  %v163_v3 = vld [vmem:[%s490_s21 + $0x10] sm:$0xff]  ;;  %v509_v10 = vld [vmem:[%s490_s21 + $0x8] sm:$0xff] }
  0x13   : > { %v492_v1 = vpop.eup %410  ;;  %v165_v4 = vld [vmem:[%s490_s21 + $0x20] sm:$0xff]  ;;  %v175_v5 = vadd.f32 %v163_v3, %v495_v2  ;;  %v225_v7 = vrot.slane %v495_v2, 7  ;;  %v503_v8 = vld [vmem:[%s490_s21 + $0x30] sm:$0xff]  ;;  %v227_v11 = vrot.slane %v163_v3, 7  ;;  %v164_v15 = vld [vmem:[%s490_s21 + $0x18] sm:$0xff]  ;;  %v226_v17 = vrot.slane %v509_v10, 7 }
  0x14   : > { %v203_v6 = vmul.f32 49.0, %v492_v1  ;;  %v506_v9 = vld [vmem:[%s490_s21 + $0x60] sm:$0x1]  ;;  %v231_v12 = vrot.slane %v165_v4, 7  ;;  %v166_v16 = vld [vmem:[%s490_s21 + $0x28] sm:$0xff]  ;;  %v518_v19 = vld [vmem:[%s490_s21 + $0x50] sm:$0xff]  ;;  %v189_v21 = vadd.f32 %v164_v15, %v509_v10  ;;  %vm207_vm1 = vweird.f32 %v492_v1 }
  0x15   : > { %v176_v13 = vadd.f32 %v175_v5, %v165_v4  ;;  %v515_v18 = vld [vmem:[%s490_s21 + $0x40] sm:$0xff]  ;;  %v168_v20 = vld [vmem:[%s490_s21 + $0x38] sm:$0xff]  ;;  %v228_v22 = vsel %vm180_vm0, %v225_v7, %v227_v11  ;;  %v229_v23 = vrot.slane %v164_v15, 7  ;;  %v181_v26 = vsel %vm180_vm0, %v506_v9, 0.0  ;;  %v535_v27 = vld [vmem:[%s490_s21 + $0x68] sm:$0x1] }
  0x16   : > { %v204_v14 = vsub.f32 1.0, %v203_v6  ;;  %v232_v24 = vsel %vm180_vm0, %v227_v11, %v231_v12  ;;  %v233_v30 = vrot.slane %v166_v16, 7  ;;  %v190_v31 = vadd.f32 %v189_v21, %v166_v16  ;;  %v170_v40 = vld [vmem:[%s490_s21 + $0x48] sm:$0xff]  ;;  %v172_v49 = vld [vmem:[%s490_s21 + $0x58] sm:$0xff] }
  0x17   : > { %v177_v25 = vadd.f32 %v176_v13, %v503_v8  ;;  %v283_v32 = vadd.f32 %v269_v28, %v228_v22  ;;  %v230_v33 = vsel %vm180_vm0, %v226_v17, %v229_v23  ;;  %v235_v36 = vrot.slane %v503_v8, 7  ;;  %v278_v5 = vld [vmem:[#allocation2 + $0x58] sm:$0xff]  ;;  %v279_v8 = vld [vmem:[#allocation2 + $0x60] sm:$0x3] }
  0x18   : > { %v205_v39 = vmul.f32 %v492_v1, %v204_v14  ;;  %v284_v41 = vadd.f32 %v270_v29, %v230_v33  ;;  %v285_v42 = vadd.f32 %v271_v34, %v232_v24  ;;  %v191_v43 = vadd.f32 %v190_v31, %v168_v20 }
  0x19   : > { %v178_v38 = vadd.f32 %v177_v25, %v515_v18  ;;  %297 = vst [vmem:[%s529_s24 + $0x10] sm:$0xff] %v283_v32  ;;  %v234_v44 = vsel %vm180_vm0, %v229_v23, %v233_v30  ;;  %v236_v45 = vsel %vm180_vm0, %v231_v12, %v235_v36  ;;  %v237_v46 = vrot.slane %v168_v20, 7  ;;  %v280_v23 = vld [vmem:[#allocation2 + $0x68] sm:$0x3] }
  0x1a   : > { %v194_v50 = vsel %vm180_vm0, %v535_v27, 0.0  ;;  %298 = vst [vmem:[%s529_s24 + $0x18] sm:$0xff] %v284_v41  ;;  %v286_v51 = vadd.f32 %v272_v35, %v234_v44  ;;  %v287_v52 = vadd.f32 %v273_v37, %v236_v45  ;;  %v192_v53 = vadd.f32 %v191_v43, %v170_v40  ;;  %v268_v43 = vld [vmem:[#allocation2 + $0x8] sm:$0xff] }
  0x1b   : > { %v179_v48 = vadd.f32 %v178_v38, %v518_v19  ;;  %299 = vst [vmem:[%s529_s24 + $0x20] sm:$0xff] %v285_v42  ;;  %v238_v54 = vsel %vm180_vm0, %v233_v30, %v237_v46  ;;  %v239_v55 = vrot.slane %v515_v18, 7  ;;  %v241_v57 = vrot.slane %v170_v40, 7  ;;  %v267_v38 = vld [vmem:[#allocation2] sm:$0xff] }
  0x1c   : > { %300 = vst [vmem:[%s529_s24 + $0x28] sm:$0xff] %v286_v51  ;;  %v288_v60 = vadd.f32 %v274_v47, %v238_v54  ;;  %v243_v61 = vrot.slane %v518_v19, 7  ;;  %v245_v63 = vrot.slane %v172_v49, 7  ;;  %v193_v0 = vadd.f32 %v192_v53, %v172_v49 }
  0x1d   : > { %v182_v59 = vadd.f32 %v181_v26, %v179_v48  ;;  %301 = vst [vmem:[%s529_s24 + $0x30] sm:$0xff] %v287_v52  ;;  %v240_v3 = vsel %vm180_vm0, %v235_v36, %v239_v55  ;;  %v242_v4 = vsel %vm180_vm0, %v237_v46, %v241_v57  ;;  %v247_v6 = vrot.slane %v506_v9, 7 }
  0x1e   : > { %302 = vst [vmem:[%s529_s24 + $0x38] sm:$0xff] %v288_v60  ;;  %v289_v12 = vadd.f32 %v275_v56, %v240_v3  ;;  %v290_v13 = vadd.f32 %v276_v58, %v242_v4  ;;  %v244_v14 = vsel %vm180_vm0, %v239_v55, %v243_v61  ;;  %v195_v15 = vadd.f32 %v194_v50, %v193_v0 }
  0x1f   : > { %v183_v11 = vrot.slane %v182_v59, 4  ;;  %v291_v16 = vadd.f32 %v277_v62, %v244_v14  ;;  %v246_v18 = vsel %vm180_vm0, %v241_v57, %v245_v63  ;;  %v248_v19 = vsel %vm180_vm0, %v243_v61, %v247_v6 }
  0x20   : > { %303 = vst [vmem:[%s529_s24 + $0x40] sm:$0xff] %v289_v12  ;;  %v292_v9 = vadd.f32 %v278_v5, %v246_v18  ;;  %v293_v21 = vadd.f32 %v279_v8, %v248_v19  ;;  %v249_v22 = vrot.slane %v535_v27, 7  ;;  %v196_v24 = vrot.slane %v195_v15, 4 }
  0x21   : > { %v184_v20 = vadd.f32 %v183_v11, %v182_v59  ;;  %304 = vst [vmem:[%s529_s24 + $0x48] sm:$0xff] %v290_v13  ;;  %v206_v28 = vadd.f32 %v492_v1, %v205_v39 }
  0x22   : > { %305 = vst [vmem:[%s529_s24 + $0x50] sm:$0xff] %v291_v16  ;;  %v250_v26 = vsel %vm180_vm0, %v245_v63, %v249_v22  ;;  %v197_v29 = vadd.f32 %v196_v24, %v195_v15 }
  0x23   : > { %v185_v25 = vrot.slane %v184_v20, 2  ;;  %306 = vst [vmem:[%s529_s24 + $0x58] sm:$0xff] %v292_v9  ;;  %v294_v30 = vadd.f32 %v280_v23, %v250_v26  ;;  %v208_v33 = vsel %vm207_vm1, %v492_v1, %v206_v28 }
  0x24   : > { %307 = vst [vmem:[%s529_s24 + $0x60] sm:$0x3] %v293_v21  ;;  %v198_v32 = vrot.slane %v197_v29, 2 }
  0x25   : > { %v186_v31 = vadd.f32 %v185_v25, %v184_v20  ;;  %308 = vst [vmem:[%s529_s24 + $0x68] sm:$0x3] %v294_v30 }
  0x26   : > { %v199_v34 = vadd.f32 %v198_v32, %v197_v29 }
  0x27   : > { %v187_v27 = vrot.slane %v186_v31, 1 }
  0x28   : > { %v200_v36 = vrot.slane %v199_v34, 1 }
  0x29   : > { %v188_v35 = vadd.f32 %v187_v27, %v186_v31 }
  0x2a   : > { %v201_v39 = vadd.f32 %v200_v36, %v199_v34 }
  0x2b   : > { %v209_v37 = vmul.f32 %v208_v33, %v188_v35 }
  0x2c   : > { %v210_v42 = vmul.f32 %v208_v33, %v201_v39 }
  0x2d   : > { %v265_v40 = vsel %vm180_vm0, %v209_v37, %v225_v7 }
  0x2e   : > { %v281_v41 = vadd.f32 %v267_v38, %v265_v40  ;;  %v266_v44 = vsel %vm180_vm0, %v210_v42, %v226_v17 }
  0x2f   : > { %v282_v45 = vadd.f32 %v268_v43, %v266_v44 }
  0x30   : > { %295 = vst [vmem:[%s529_s24] sm:$0xff] %v281_v41 }
  0x31   : > { %296 = vst [vmem:[%s529_s24 + $0x8] sm:$0xff] %v282_v45 }
  0x32 PF: > { %s13_s9 = sadd.s32 1, %s452_s9  }
  0x33   : > { %p10_p7 = scmp.ge.s32.totalorder %s13_s9, 4  }
  0x35   :  { %12 = sbr.rel (!%p10_p7) target bundleno = 1 (0x1), region = 63 }
  0x3a   :  { %330 = vsyncpa [#allocation3], 1 }
  0x3b   :  { %332 = vsyncpa [#allocation3 + $0x1], 1 }

// kernel: attention_pool_2d.7
= control target key start
LH: loop header
LB: loop body
LE: loop exit
PB: predicated region body
PF: predicated region fallthrough
CT: control target
= control target key end

     0   :  { %s681_s1 = inlined_call_operand.vmem [shape: bf16[256,256], index: 1, kind: input, shape index: {}]   ;;  %s682_s0 = inlined_call_operand.vmem [shape: bf16[8,256], index: 0, kind: input, shape index: {}]   ;;  %s683_s2 = inlined_call_operand.vmem [shape: f32[1,256], index: 2, kind: input, shape index: {}]   ;;  %s684_s3 = inlined_call_operand.vmem [shape: f32[8,256], index: 3, kind: output, shape index: {}]  }
   0x1   :  { %v355_v0 = vld [vmem:[%s681_s1 + $0x70] sm:$0xf]  ;;  %v440_v1 = vld [vmem:[%s681_s1 + $0x74] sm:$0xf0]  ;;  %v439_v5 = vld [vmem:[%s681_s1 + $0x74] sm:$0xf] }
   0x2   :  { %v419_v2 = vld [vmem:[%s681_s1 + $0xf0] sm:$0xf]  ;;  %v356_v3 = vor.u32 %v440_v1, %v355_v0  ;;  %v456_v4 = vld [vmem:[%s681_s1 + $0xf4] sm:$0xf0]  ;;  %v357_v6 = vld [vmem:[%s681_s1 + $0x78] sm:$0xf0] }
   0x3   :  { %v420_v7 = vor.u32 %v456_v4, %v419_v2  ;;  %v360_v8 = vor.u32 %v439_v5, %v357_v6  ;;  %v455_v9 = vld [vmem:[%s681_s1 + $0xf4] sm:$0xf]  ;;  %v421_v10 = vld [vmem:[%s681_s1 + $0xf8] sm:$0xf0]  ;;  %v347_v11 = vld [vmem:[%s681_s1 + $0x60] sm:$0xf] }
   0x4   :  { %222 = vmatpush.bf16.msra.mxu0 %v356_v3  ;;  %v424_v12 = vor.u32 %v455_v9, %v421_v10  ;;  %v438_v13 = vld [vmem:[%s681_s1 + $0x64] sm:$0xf0]  ;;  %v411_v14 = vld [vmem:[%s681_s1 + $0xe0] sm:$0xf]  ;;  %v437_v18 = vld [vmem:[%s681_s1 + $0x64] sm:$0xf] }
   0x5   :  { %v454_v15 = vld [vmem:[%s681_s1 + $0xe4] sm:$0xf0]  ;;  %235 = vmatpush.bf16.msra.mxu1 %v420_v7  ;;  %248 = vmatpush.bf16.msra.mxu2 %v360_v8  ;;  %v348_v16 = vor.u32 %v438_v13, %v347_v11  ;;  %v349_v19 = vld [vmem:[%s681_s1 + $0x68] sm:$0xf0]  ;;  %v453_v20 = vld [vmem:[%s681_s1 + $0xe4] sm:$0xf] }
   0x6   :  { %v412_v17 = vor.u32 %v454_v15, %v411_v14  ;;  %261 = vmatpush.bf16.msra.mxu3 %v424_v12  ;;  %v352_v21 = vor.u32 %v437_v18, %v349_v19  ;;  %v413_v22 = vld [vmem:[%s681_s1 + $0xe8] sm:$0xf0]  ;;  %v339_v23 = vld [vmem:[%s681_s1 + $0x50] sm:$0xf]  ;;  %v436_v24 = vld [vmem:[%s681_s1 + $0x54] sm:$0xf0] }
   0x7   :  { %v416_v25 = vor.u32 %v453_v20, %v413_v22  ;;  %v403_v26 = vld [vmem:[%s681_s1 + $0xd0] sm:$0xf]  ;;  %v452_v27 = vld [vmem:[%s681_s1 + $0xd4] sm:$0xf0]  ;;  %v435_v28 = vld [vmem:[%s681_s1 + $0x54] sm:$0xf]  ;;  %v340_v29 = vor.u32 %v436_v24, %v339_v23 }
   0x8   :  { %223 = vmatpush.bf16.msra.mxu0 %v348_v16  ;;  %v341_v30 = vld [vmem:[%s681_s1 + $0x58] sm:$0xf0]  ;;  %v451_v31 = vld [vmem:[%s681_s1 + $0xd4] sm:$0xf]  ;;  %v404_v33 = vor.u32 %v452_v27, %v403_v26  ;;  %v331_v35 = vld [vmem:[%s681_s1 + $0x40] sm:$0xf] }
   0x9   :  { %v405_v32 = vld [vmem:[%s681_s1 + $0xd8] sm:$0xf0]  ;;  %236 = vmatpush.bf16.msra.mxu1 %v412_v17  ;;  %249 = vmatpush.bf16.msra.mxu2 %v352_v21  ;;  %v344_v34 = vor.u32 %v435_v28, %v341_v30  ;;  %v434_v36 = vld [vmem:[%s681_s1 + $0x44] sm:$0xf0]  ;;  %v395_v37 = vld [vmem:[%s681_s1 + $0xc0] sm:$0xf] }
   0xa   :  { %262 = vmatpush.bf16.msra.mxu3 %v416_v25  ;;  %v408_v38 = vor.u32 %v451_v31, %v405_v32  ;;  %v450_v39 = vld [vmem:[%s681_s1 + $0xc4] sm:$0xf0]  ;;  %v433_v40 = vld [vmem:[%s681_s1 + $0x44] sm:$0xf]  ;;  %v333_v41 = vld [vmem:[%s681_s1 + $0x48] sm:$0xf0]  ;;  %v332_v44 = vor.u32 %v434_v36, %v331_v35 }
   0xb   :  { %v449_v42 = vld [vmem:[%s681_s1 + $0xc4] sm:$0xf]  ;;  %v397_v43 = vld [vmem:[%s681_s1 + $0xc8] sm:$0xf0]  ;;  %v396_v45 = vor.u32 %v450_v39, %v395_v37  ;;  %v336_v46 = vor.u32 %v433_v40, %v333_v41  ;;  %v323_v47 = vld [vmem:[%s681_s1 + $0x30] sm:$0xf] }
   0xc   :  { %224 = vmatpush.bf16.msra.mxu0 %v340_v29  ;;  %v432_v48 = vld [vmem:[%s681_s1 + $0x34] sm:$0xf0]  ;;  %v387_v49 = vld [vmem:[%s681_s1 + $0xb0] sm:$0xf]  ;;  %v400_v50 = vor.u32 %v449_v42, %v397_v43  ;;  %v431_v52 = vld [vmem:[%s681_s1 + $0x34] sm:$0xf] }
   0xd   :  { %237 = vmatpush.bf16.msra.mxu1 %v404_v33  ;;  %250 = vmatpush.bf16.msra.mxu2 %v344_v34  ;;  %v448_v51 = vld [vmem:[%s681_s1 + $0xb4] sm:$0xf0]  ;;  %v325_v53 = vld [vmem:[%s681_s1 + $0x38] sm:$0xf0]  ;;  %v447_v54 = vld [vmem:[%s681_s1 + $0xb4] sm:$0xf]  ;;  %v324_v56 = vor.u32 %v432_v48, %v323_v47 }
   0xe   :  { %263 = vmatpush.bf16.msra.mxu3 %v408_v38  ;;  %v389_v55 = vld [vmem:[%s681_s1 + $0xb8] sm:$0xf0]  ;;  %v388_v57 = vor.u32 %v448_v51, %v387_v49  ;;  %v328_v58 = vor.u32 %v431_v52, %v325_v53  ;;  %v315_v59 = vld [vmem:[%s681_s1 + $0x20] sm:$0xf]  ;;  %v430_v60 = vld [vmem:[%s681_s1 + $0x24] sm:$0xf0] }
   0xf   :  { %v379_v61 = vld [vmem:[%s681_s1 + $0xa0] sm:$0xf]  ;;  %v392_v62 = vor.u32 %v447_v54, %v389_v55  ;;  %v446_v63 = vld [vmem:[%s681_s1 + $0xa4] sm:$0xf0]  ;;  %v429_v0 = vld [vmem:[%s681_s1 + $0x24] sm:$0xf]  ;;  %v316_v4 = vor.u32 %v430_v60, %v315_v59 }
  0x10   :  { %225 = vmatpush.bf16.msra.mxu0 %v332_v44  ;;  %v317_v1 = vld [vmem:[%s681_s1 + $0x28] sm:$0xf0]  ;;  %v445_v2 = vld [vmem:[%s681_s1 + $0xa4] sm:$0xf]  ;;  %v380_v5 = vor.u32 %v446_v63, %v379_v61  ;;  %v307_v7 = vld [vmem:[%s681_s1 + $0x10] sm:$0xf] }
  0x11   :  { %238 = vmatpush.bf16.msra.mxu1 %v396_v45  ;;  %251 = vmatpush.bf16.msra.mxu2 %v336_v46  ;;  %v381_v3 = vld [vmem:[%s681_s1 + $0xa8] sm:$0xf0]  ;;  %v320_v6 = vor.u32 %v429_v0, %v317_v1  ;;  %v428_v8 = vld [vmem:[%s681_s1 + $0x14] sm:$0xf0]  ;;  %v371_v9 = vld [vmem:[%s681_s1 + $0x90] sm:$0xf] }
  0x12   :  { %264 = vmatpush.bf16.msra.mxu3 %v400_v50  ;;  %v384_v10 = vor.u32 %v445_v2, %v381_v3  ;;  %v444_v11 = vld [vmem:[%s681_s1 + $0x94] sm:$0xf0]  ;;  %v427_v12 = vld [vmem:[%s681_s1 + $0x14] sm:$0xf]  ;;  %v309_v13 = vld [vmem:[%s681_s1 + $0x18] sm:$0xf0]  ;;  %v308_v16 = vor.u32 %v428_v8, %v307_v7 }
  0x13   :  { %v443_v14 = vld [vmem:[%s681_s1 + $0x94] sm:$0xf]  ;;  %v373_v15 = vld [vmem:[%s681_s1 + $0x98] sm:$0xf0]  ;;  %v22_v17 = vld [vmem:[%s682_s0] sm:$0xff]  ;;  %v372_v18 = vor.u32 %v444_v11, %v371_v9  ;;  %v312_v19 = vor.u32 %v427_v12, %v309_v13 }
  0x14   :  { %226 = vmatpush.bf16.msra.mxu0 %v324_v56  ;;  %v299_v20 = vld [vmem:[%s681_s1] sm:$0xf]  ;;  %v426_v21 = vld [vmem:[%s681_s1 + $0x4] sm:$0xf0]  ;;  %v376_v23 = vor.u32 %v443_v14, %v373_v15  ;;  %v425_v25 = vld [vmem:[%s681_s1 + $0x4] sm:$0xf]  ;;  %v56_v29 = vunpack.c.l.b16 %v22_v17  ;;  %v57_v31 = vunpack.c.h.b16 %v22_v17 }
  0x15   :  { %239 = vmatpush.bf16.msra.mxu1 %v388_v57  ;;  %252 = vmatpush.bf16.msra.mxu2 %v328_v58  ;;  %v363_v22 = vld [vmem:[%s681_s1 + $0x80] sm:$0xf]  ;;  %v442_v24 = vld [vmem:[%s681_s1 + $0x84] sm:$0xf0]  ;;  %v301_v26 = vld [vmem:[%s681_s1 + $0x8] sm:$0xf0]  ;;  %v300_v30 = vor.u32 %v426_v21, %v299_v20 }
  0x16   :  { %265 = vmatpush.bf16.msra.mxu3 %v392_v62  ;;  %v441_v27 = vld [vmem:[%s681_s1 + $0x84] sm:$0xf]  ;;  %v365_v28 = vld [vmem:[%s681_s1 + $0x88] sm:$0xf0]  ;;  %v364_v32 = vor.u32 %v442_v24, %v363_v22  ;;  %v304_v33 = vor.u32 %v425_v25, %v301_v26  ;;  %v58_v35 = vpack.c.b16 %v56_v29, %v56_v29  ;;  %v59_v36 = vpack.c.b16 %v57_v31, %v57_v31  ;;  %v283_v37 = vld [vmem:[%s683_s2] sm:$0x3] }
  0x17   :  { %v368_v34 = vor.u32 %v441_v27, %v365_v28  ;;  %v285_v39 = vperm.slane %v283_v37, 0  ;;  %v286_v44 = vperm.slane %v283_v37, 1 }
  0x18   :  { %227 = vmatpush.bf16.msra.mxu0 %v316_v4 }
  0x19   :  { %240 = vmatpush.bf16.msra.mxu1 %v380_v5  ;;  %253 = vmatpush.bf16.msra.mxu2 %v320_v6 }
  0x1a   :  { %266 = vmatpush.bf16.msra.mxu3 %v384_v10 }
  0x1c   :  { %228 = vmatpush.bf16.msra.mxu0 %v308_v16 }
  0x1d   :  { %241 = vmatpush.bf16.msra.mxu1 %v372_v18  ;;  %254 = vmatpush.bf16.msra.mxu2 %v312_v19 }
  0x1e   :  { %267 = vmatpush.bf16.msra.mxu3 %v376_v23 }
  0x20   :  { %229 = vmatpush.bf16.msra.mxu0 %v300_v30 }
  0x21   :  { %242 = vmatpush.bf16.msra.mxu1 %v364_v32  ;;  %255 = vmatpush.bf16.msra.mxu2 %v304_v33 }
  0x22   :  { %268 = vmatpush.bf16.msra.mxu3 %v368_v34 }
  0x23   :  { %230 = vmatmul.bf16.vlgmr.msra.gmra.mxu0 %v58_v35 }
  0x24   :  { %243 = vmatmul.bf16.vlgmr.msra.gmra.mxu1 %v59_v36  ;;  %256 = vmatmul.bf16.vlgmr.msra.gmra.mxu2 %v58_v35 }
  0x25   :  { %269 = vmatmul.bf16.vlgmr.msra.gmra.mxu3 %v59_v36 }
  0xa0   :  { %v231_v38 = vpop.f32.mrf.mxu0 }
  0xa1   :  { %v244_v40 = vpop.f32.mrf.mxu1 }
  0xa2   :  { %v245_v41 = vadd.f32 %v244_v40, %v231_v38 }
  0xa4   :  { %v289_v42 = vadd.f32 %v285_v39, %v245_v41 }
  0xa6   :  { %291 = vst [vmem:[%s684_s3] sm:$0xff] %v289_v42 }
  0xa7   :  { %v257_v43 = vpop.f32.mrf.mxu2 }
  0xa8   :  { %v270_v45 = vpop.f32.mrf.mxu3  ;;  %v233_v46 = vpop.f32.mrf.mxu0 }
  0xa9   :  { %v271_v47 = vadd.f32 %v270_v45, %v257_v43  ;;  %v246_v48 = vpop.f32.mrf.mxu1 }
  0xab   :  { %v290_v49 = vadd.f32 %v286_v44, %v271_v47 }
  0xad   :  { %292 = vst [vmem:[%s684_s3 + $0x8] sm:$0xff] %v290_v49 }
  0xaf   :  { %v259_v50 = vpop.f32.mrf.mxu2 }
  0xb0   :  { %v272_v51 = vpop.f32.mrf.mxu3 }

// kernel: attention_pool_2d.8
= control target key start
LH: loop header
LB: loop body
LE: loop exit
PB: predicated region body
PF: predicated region fallthrough
CT: control target
= control target key end

     0   :  { %s1275_s1 = inlined_call_operand.vmem [shape: bf16[256,256], index: 1, kind: input, shape index: {}]   ;;  %s1276_s0 = inlined_call_operand.vmem [shape: bf16[104,256], index: 0, kind: input, shape index: {}]   ;;  %s1277_s2 = inlined_call_operand.vmem [shape: f32[1,256], index: 2, kind: input, shape index: {}]   ;;  %s1278_s3 = inlined_call_operand.vmem [shape: f32[104,256], index: 3, kind: output, shape index: {}]  }
   0x1   :  { %v763_v0 = vld [vmem:[%s1275_s1 + $0x70] sm:$0xf]  ;;  %v860_v1 = vld [vmem:[%s1275_s1 + $0x74] sm:$0xf0]  ;;  %v859_v5 = vld [vmem:[%s1275_s1 + $0x74] sm:$0xf] }
   0x2   :  { %v827_v2 = vld [vmem:[%s1275_s1 + $0xf0] sm:$0xf]  ;;  %v764_v3 = vor.u32 %v860_v1, %v763_v0  ;;  %v876_v4 = vld [vmem:[%s1275_s1 + $0xf4] sm:$0xf0]  ;;  %v765_v6 = vld [vmem:[%s1275_s1 + $0x78] sm:$0xf0] }
   0x3   :  { %v828_v7 = vor.u32 %v876_v4, %v827_v2  ;;  %v768_v8 = vor.u32 %v859_v5, %v765_v6  ;;  %v875_v9 = vld [vmem:[%s1275_s1 + $0xf4] sm:$0xf]  ;;  %v829_v10 = vld [vmem:[%s1275_s1 + $0xf8] sm:$0xf0]  ;;  %v755_v11 = vld [vmem:[%s1275_s1 + $0x60] sm:$0xf] }
   0x4   :  { %342 = vmatpush.bf16.msra.mxu0 %v764_v3  ;;  %v832_v12 = vor.u32 %v875_v9, %v829_v10  ;;  %v858_v13 = vld [vmem:[%s1275_s1 + $0x64] sm:$0xf0]  ;;  %v819_v14 = vld [vmem:[%s1275_s1 + $0xe0] sm:$0xf]  ;;  %v857_v18 = vld [vmem:[%s1275_s1 + $0x64] sm:$0xf] }
   0x5   :  { %v874_v15 = vld [vmem:[%s1275_s1 + $0xe4] sm:$0xf0]  ;;  %385 = vmatpush.bf16.msra.mxu1 %v828_v7  ;;  %428 = vmatpush.bf16.msra.mxu2 %v768_v8  ;;  %v756_v16 = vor.u32 %v858_v13, %v755_v11  ;;  %v757_v19 = vld [vmem:[%s1275_s1 + $0x68] sm:$0xf0]  ;;  %v873_v20 = vld [vmem:[%s1275_s1 + $0xe4] sm:$0xf] }
   0x6   :  { %v820_v17 = vor.u32 %v874_v15, %v819_v14  ;;  %471 = vmatpush.bf16.msra.mxu3 %v832_v12  ;;  %v760_v21 = vor.u32 %v857_v18, %v757_v19  ;;  %v821_v22 = vld [vmem:[%s1275_s1 + $0xe8] sm:$0xf0]  ;;  %v747_v23 = vld [vmem:[%s1275_s1 + $0x50] sm:$0xf]  ;;  %v856_v24 = vld [vmem:[%s1275_s1 + $0x54] sm:$0xf0] }
   0x7   :  { %v824_v25 = vor.u32 %v873_v20, %v821_v22  ;;  %v811_v26 = vld [vmem:[%s1275_s1 + $0xd0] sm:$0xf]  ;;  %v872_v27 = vld [vmem:[%s1275_s1 + $0xd4] sm:$0xf0]  ;;  %v855_v28 = vld [vmem:[%s1275_s1 + $0x54] sm:$0xf]  ;;  %v748_v29 = vor.u32 %v856_v24, %v747_v23 }
   0x8   :  { %343 = vmatpush.bf16.msra.mxu0 %v756_v16  ;;  %v749_v30 = vld [vmem:[%s1275_s1 + $0x58] sm:$0xf0]  ;;  %v871_v31 = vld [vmem:[%s1275_s1 + $0xd4] sm:$0xf]  ;;  %v812_v33 = vor.u32 %v872_v27, %v811_v26  ;;  %v739_v35 = vld [vmem:[%s1275_s1 + $0x40] sm:$0xf] }
   0x9   :  { %v813_v32 = vld [vmem:[%s1275_s1 + $0xd8] sm:$0xf0]  ;;  %386 = vmatpush.bf16.msra.mxu1 %v820_v17  ;;  %429 = vmatpush.bf16.msra.mxu2 %v760_v21  ;;  %v752_v34 = vor.u32 %v855_v28, %v749_v30  ;;  %v854_v36 = vld [vmem:[%s1275_s1 + $0x44] sm:$0xf0]  ;;  %v803_v37 = vld [vmem:[%s1275_s1 + $0xc0] sm:$0xf] }
   0xa   :  { %472 = vmatpush.bf16.msra.mxu3 %v824_v25  ;;  %v816_v38 = vor.u32 %v871_v31, %v813_v32  ;;  %v870_v39 = vld [vmem:[%s1275_s1 + $0xc4] sm:$0xf0]  ;;  %v853_v40 = vld [vmem:[%s1275_s1 + $0x44] sm:$0xf]  ;;  %v741_v41 = vld [vmem:[%s1275_s1 + $0x48] sm:$0xf0]  ;;  %v740_v44 = vor.u32 %v854_v36, %v739_v35 }
   0xb   :  { %v869_v42 = vld [vmem:[%s1275_s1 + $0xc4] sm:$0xf]  ;;  %v805_v43 = vld [vmem:[%s1275_s1 + $0xc8] sm:$0xf0]  ;;  %v804_v45 = vor.u32 %v870_v39, %v803_v37  ;;  %v744_v46 = vor.u32 %v853_v40, %v741_v41  ;;  %v731_v47 = vld [vmem:[%s1275_s1 + $0x30] sm:$0xf] }
   0xc   :  { %344 = vmatpush.bf16.msra.mxu0 %v748_v29  ;;  %v852_v48 = vld [vmem:[%s1275_s1 + $0x34] sm:$0xf0]  ;;  %v795_v49 = vld [vmem:[%s1275_s1 + $0xb0] sm:$0xf]  ;;  %v808_v50 = vor.u32 %v869_v42, %v805_v43  ;;  %v851_v52 = vld [vmem:[%s1275_s1 + $0x34] sm:$0xf] }
   0xd   :  { %387 = vmatpush.bf16.msra.mxu1 %v812_v33  ;;  %430 = vmatpush.bf16.msra.mxu2 %v752_v34  ;;  %v868_v51 = vld [vmem:[%s1275_s1 + $0xb4] sm:$0xf0]  ;;  %v733_v53 = vld [vmem:[%s1275_s1 + $0x38] sm:$0xf0]  ;;  %v867_v54 = vld [vmem:[%s1275_s1 + $0xb4] sm:$0xf]  ;;  %v732_v56 = vor.u32 %v852_v48, %v731_v47 }
   0xe   :  { %473 = vmatpush.bf16.msra.mxu3 %v816_v38  ;;  %v797_v55 = vld [vmem:[%s1275_s1 + $0xb8] sm:$0xf0]  ;;  %v796_v57 = vor.u32 %v868_v51, %v795_v49  ;;  %v736_v58 = vor.u32 %v851_v52, %v733_v53  ;;  %v723_v59 = vld [vmem:[%s1275_s1 + $0x20] sm:$0xf]  ;;  %v850_v60 = vld [vmem:[%s1275_s1 + $0x24] sm:$0xf0] }
   0xf   :  { %v787_v61 = vld [vmem:[%s1275_s1 + $0xa0] sm:$0xf]  ;;  %v800_v62 = vor.u32 %v867_v54, %v797_v55  ;;  %v866_v63 = vld [vmem:[%s1275_s1 + $0xa4] sm:$0xf0]  ;;  %v849_v0 = vld [vmem:[%s1275_s1 + $0x24] sm:$0xf]  ;;  %v724_v4 = vor.u32 %v850_v60, %v723_v59 }
  0x10   :  { %345 = vmatpush.bf16.msra.mxu0 %v740_v44  ;;  %v725_v1 = vld [vmem:[%s1275_s1 + $0x28] sm:$0xf0]  ;;  %v865_v2 = vld [vmem:[%s1275_s1 + $0xa4] sm:$0xf]  ;;  %v788_v5 = vor.u32 %v866_v63, %v787_v61  ;;  %v715_v7 = vld [vmem:[%s1275_s1 + $0x10] sm:$0xf] }
  0x11   :  { %388 = vmatpush.bf16.msra.mxu1 %v804_v45  ;;  %431 = vmatpush.bf16.msra.mxu2 %v744_v46  ;;  %v789_v3 = vld [vmem:[%s1275_s1 + $0xa8] sm:$0xf0]  ;;  %v728_v6 = vor.u32 %v849_v0, %v725_v1  ;;  %v848_v8 = vld [vmem:[%s1275_s1 + $0x14] sm:$0xf0]  ;;  %v779_v9 = vld [vmem:[%s1275_s1 + $0x90] sm:$0xf] }
  0x12   :  { %474 = vmatpush.bf16.msra.mxu3 %v808_v50  ;;  %v792_v10 = vor.u32 %v865_v2, %v789_v3  ;;  %v864_v11 = vld [vmem:[%s1275_s1 + $0x94] sm:$0xf0]  ;;  %v847_v12 = vld [vmem:[%s1275_s1 + $0x14] sm:$0xf]  ;;  %v717_v13 = vld [vmem:[%s1275_s1 + $0x18] sm:$0xf0]  ;;  %v716_v16 = vor.u32 %v848_v8, %v715_v7 }
  0x13   :  { %v863_v14 = vld [vmem:[%s1275_s1 + $0x94] sm:$0xf]  ;;  %v781_v15 = vld [vmem:[%s1275_s1 + $0x98] sm:$0xf0]  ;;  %v780_v17 = vor.u32 %v864_v11, %v779_v9  ;;  %v720_v18 = vor.u32 %v847_v12, %v717_v13  ;;  %v707_v19 = vld [vmem:[%s1275_s1] sm:$0xf] }
  0x14   :  { %346 = vmatpush.bf16.msra.mxu0 %v732_v56  ;;  %v846_v20 = vld [vmem:[%s1275_s1 + $0x4] sm:$0xf0]  ;;  %v771_v21 = vld [vmem:[%s1275_s1 + $0x80] sm:$0xf]  ;;  %v784_v22 = vor.u32 %v863_v14, %v781_v15  ;;  %v845_v24 = vld [vmem:[%s1275_s1 + $0x4] sm:$0xf] }
  0x15   :  { %389 = vmatpush.bf16.msra.mxu1 %v796_v57  ;;  %432 = vmatpush.bf16.msra.mxu2 %v736_v58  ;;  %v862_v23 = vld [vmem:[%s1275_s1 + $0x84] sm:$0xf0]  ;;  %v709_v25 = vld [vmem:[%s1275_s1 + $0x8] sm:$0xf0]  ;;  %v861_v26 = vld [vmem:[%s1275_s1 + $0x84] sm:$0xf]  ;;  %v708_v28 = vor.u32 %v846_v20, %v707_v19 }
  0x16   :  { %475 = vmatpush.bf16.msra.mxu3 %v800_v62  ;;  %v773_v27 = vld [vmem:[%s1275_s1 + $0x88] sm:$0xf0]  ;;  %v659_v29 = vld [vmem:[%s1276_s0] sm:$0xf]  ;;  %v834_v30 = vld [vmem:[%s1276_s0 + $0x4] sm:$0xf0]  ;;  %v772_v31 = vor.u32 %v862_v23, %v771_v21  ;;  %v712_v32 = vor.u32 %v845_v24, %v709_v25 }
  0x17   :  { %v833_v33 = vld [vmem:[%s1276_s0 + $0x4] sm:$0xf]  ;;  %v661_v34 = vld [vmem:[%s1276_s0 + $0x8] sm:$0xf0]  ;;  %v776_v35 = vor.u32 %v861_v26, %v773_v27  ;;  %v660_v36 = vor.u32 %v834_v30, %v659_v29  ;;  %v667_v38 = vld [vmem:[%s1276_s0 + $0x10] sm:$0xf] }
  0x18   :  { %347 = vmatpush.bf16.msra.mxu0 %v724_v4  ;;  %v664_v37 = vor.u32 %v833_v33, %v661_v34  ;;  %v836_v39 = vld [vmem:[%s1276_s0 + $0x14] sm:$0xf0]  ;;  %v835_v40 = vld [vmem:[%s1276_s0 + $0x14] sm:$0xf]  ;;  %v669_v41 = vld [vmem:[%s1276_s0 + $0x18] sm:$0xf0] }
  0x19   :  { %390 = vmatpush.bf16.msra.mxu1 %v788_v5  ;;  %433 = vmatpush.bf16.msra.mxu2 %v728_v6  ;;  %v668_v42 = vor.u32 %v836_v39, %v667_v38  ;;  %v672_v43 = vor.u32 %v835_v40, %v669_v41  ;;  %v675_v44 = vld [vmem:[%s1276_s0 + $0x20] sm:$0xf]  ;;  %v838_v45 = vld [vmem:[%s1276_s0 + $0x24] sm:$0xf0]  ;;  %v837_v46 = vld [vmem:[%s1276_s0 + $0x24] sm:$0xf] }
  0x1a   :  { %476 = vmatpush.bf16.msra.mxu3 %v792_v10  ;;  %v677_v47 = vld [vmem:[%s1276_s0 + $0x28] sm:$0xf0]  ;;  %v676_v48 = vor.u32 %v838_v45, %v675_v44  ;;  %v683_v50 = vld [vmem:[%s1276_s0 + $0x30] sm:$0xf]  ;;  %v840_v51 = vld [vmem:[%s1276_s0 + $0x34] sm:$0xf0] }
  0x1b   :  { %v680_v49 = vor.u32 %v837_v46, %v677_v47  ;;  %v839_v52 = vld [vmem:[%s1276_s0 + $0x34] sm:$0xf]  ;;  %v685_v53 = vld [vmem:[%s1276_s0 + $0x38] sm:$0xf0]  ;;  %v684_v54 = vor.u32 %v840_v51, %v683_v50  ;;  %v691_v56 = vld [vmem:[%s1276_s0 + $0x40] sm:$0xf] }
  0x1c   :  { %348 = vmatpush.bf16.msra.mxu0 %v716_v16  ;;  %v688_v55 = vor.u32 %v839_v52, %v685_v53  ;;  %v842_v57 = vld [vmem:[%s1276_s0 + $0x44] sm:$0xf0]  ;;  %v841_v58 = vld [vmem:[%s1276_s0 + $0x44] sm:$0xf]  ;;  %v693_v59 = vld [vmem:[%s1276_s0 + $0x48] sm:$0xf0] }
  0x1d   :  { %391 = vmatpush.bf16.msra.mxu1 %v780_v17  ;;  %434 = vmatpush.bf16.msra.mxu2 %v720_v18  ;;  %v692_v60 = vor.u32 %v842_v57, %v691_v56  ;;  %v696_v61 = vor.u32 %v841_v58, %v693_v59  ;;  %v699_v62 = vld [vmem:[%s1276_s0 + $0x50] sm:$0xf]  ;;  %v844_v63 = vld [vmem:[%s1276_s0 + $0x54] sm:$0xf0]  ;;  %v843_v0 = vld [vmem:[%s1276_s0 + $0x54] sm:$0xf] }
  0x1e   :  { %477 = vmatpush.bf16.msra.mxu3 %v784_v22  ;;  %v701_v1 = vld [vmem:[%s1276_s0 + $0x58] sm:$0xf0]  ;;  %v700_v2 = vor.u32 %v844_v63, %v699_v62  ;;  %v82_v4 = vld [vmem:[%s1276_s0 + $0x60] sm:$0xff] }
  0x1f   :  { %v704_v3 = vor.u32 %v843_v0, %v701_v1  ;;  %v152_v5 = vunpack.c.l.b16 %v82_v4  ;;  %v153_v6 = vunpack.c.h.b16 %v82_v4  ;;  %v595_v9 = vld [vmem:[%s1277_s2] sm:$0x3] }
  0x20   :  { %349 = vmatpush.bf16.msra.mxu0 %v708_v28  ;;  %v1167_v11 = vperm.slane %v595_v9, 0  ;;  %v1173_v16 = vperm.slane %v595_v9, 1 }
  0x21   :  { %392 = vmatpush.bf16.msra.mxu1 %v772_v31  ;;  %435 = vmatpush.bf16.msra.mxu2 %v712_v32  ;;  %v166_v7 = vpack.c.b16 %v152_v5, %v152_v5  ;;  %v167_v8 = vpack.c.b16 %v153_v6, %v153_v6 }
  0x22   :  { %478 = vmatpush.bf16.msra.mxu3 %v776_v35 }
  0x23   :  { %350 = vmatmul.bf16.vlgmr.msra.gmra.mxu0 %v660_v36 }
  0x24   :  { %393 = vmatmul.bf16.vlgmr.msra.gmra.mxu1 %v664_v37  ;;  %436 = vmatmul.bf16.vlgmr.msra.gmra.mxu2 %v660_v36 }
  0x25   :  { %479 = vmatmul.bf16.vlgmr.msra.gmra.mxu3 %v664_v37 }
  0x33   :  { %355 = vmatmul.bf16.gmra.mxu0 %v668_v42 }
  0x34   :  { %398 = vmatmul.bf16.gmra.mxu1 %v672_v43  ;;  %441 = vmatmul.bf16.gmra.mxu2 %v668_v42 }
  0x35   :  { %484 = vmatmul.bf16.gmra.mxu3 %v672_v43 }
  0x43   :  { %360 = vmatmul.bf16.gmra.mxu0 %v676_v48 }
  0x44   :  { %403 = vmatmul.bf16.gmra.mxu1 %v680_v49  ;;  %446 = vmatmul.bf16.gmra.mxu2 %v676_v48 }
  0x45   :  { %489 = vmatmul.bf16.gmra.mxu3 %v680_v49 }
  0x53   :  { %365 = vmatmul.bf16.gmra.mxu0 %v684_v54 }
  0x54   :  { %408 = vmatmul.bf16.gmra.mxu1 %v688_v55  ;;  %451 = vmatmul.bf16.gmra.mxu2 %v684_v54 }
  0x55   :  { %494 = vmatmul.bf16.gmra.mxu3 %v688_v55 }
  0x63   :  { %370 = vmatmul.bf16.gmra.mxu0 %v692_v60 }
  0x64   :  { %413 = vmatmul.bf16.gmra.mxu1 %v696_v61  ;;  %456 = vmatmul.bf16.gmra.mxu2 %v692_v60 }
  0x65   :  { %499 = vmatmul.bf16.gmra.mxu3 %v696_v61 }
  0x73   :  { %375 = vmatmul.bf16.gmra.mxu0 %v700_v2 }
  0x74   :  { %418 = vmatmul.bf16.gmra.mxu1 %v704_v3  ;;  %461 = vmatmul.bf16.gmra.mxu2 %v700_v2 }
  0x75   :  { %504 = vmatmul.bf16.gmra.mxu3 %v704_v3 }
  0x83   :  { %380 = vmatmul.bf16.gmra.mxu0 %v166_v7 }
  0x84   :  { %423 = vmatmul.bf16.gmra.mxu1 %v167_v8  ;;  %466 = vmatmul.bf16.gmra.mxu2 %v166_v7 }
  0x85   :  { %509 = vmatmul.bf16.gmra.mxu3 %v167_v8 }
  0xa0   :  { %v351_v10 = vpop.f32.mrf.mxu0 }
  0xa1   :  { %v394_v12 = vpop.f32.mrf.mxu1 }
  0xa2   :  { %v395_v13 = vadd.f32 %v394_v12, %v351_v10 }
  0xa4   :  { %v601_v14 = vadd.f32 %v1167_v11, %v395_v13 }
  0xa6   :  { %627 = vst [vmem:[%s1278_s3] sm:$0xff] %v601_v14 }
  0xa7   :  { %v437_v15 = vpop.f32.mrf.mxu2 }
  0xa8   :  { %v480_v17 = vpop.f32.mrf.mxu3  ;;  %v353_v18 = vpop.f32.mrf.mxu0 }
  0xa9   :  { %v481_v19 = vadd.f32 %v480_v17, %v437_v15  ;;  %v396_v20 = vpop.f32.mrf.mxu1 }
  0xaa   :  { %v397_v21 = vadd.f32 %v396_v20, %v353_v18 }
  0xab   :  { %v602_v22 = vadd.f32 %v1173_v16, %v481_v19 }
  0xac   :  { %v603_v23 = vadd.f32 %v1167_v11, %v397_v21 }
  0xad   :  { %628 = vst [vmem:[%s1278_s3 + $0x8] sm:$0xff] %v602_v22 }
  0xae   :  { %629 = vst [vmem:[%s1278_s3 + $0x10] sm:$0xff] %v603_v23 }
  0xaf   :  { %v439_v24 = vpop.f32.mrf.mxu2 }
  0xb0   :  { %v482_v25 = vpop.f32.mrf.mxu3  ;;  %v356_v26 = vpop.f32.mrf.mxu0 }
  0xb1   :  { %v483_v27 = vadd.f32 %v482_v25, %v439_v24  ;;  %v399_v28 = vpop.f32.mrf.mxu1 }
  0xb2   :  { %v400_v29 = vadd.f32 %v399_v28, %v356_v26 }
  0xb3   :  { %v604_v30 = vadd.f32 %v1173_v16, %v483_v27 }
  0xb4   :  { %v605_v31 = vadd.f32 %v1167_v11, %v400_v29 }
  0xb5   :  { %630 = vst [vmem:[%s1278_s3 + $0x18] sm:$0xff] %v604_v30 }
  0xb6   :  { %631 = vst [vmem:[%s1278_s3 + $0x20] sm:$0xff] %v605_v31 }
  0xb7   :  { %v442_v32 = vpop.f32.mrf.mxu2 }
  0xb8   :  { %v485_v33 = vpop.f32.mrf.mxu3  ;;  %v358_v34 = vpop.f32.mrf.mxu0 }
  0xb9   :  { %v486_v35 = vadd.f32 %v485_v33, %v442_v32  ;;  %v401_v36 = vpop.f32.mrf.mxu1 }
  0xba   :  { %v402_v37 = vadd.f32 %v401_v36, %v358_v34 }
  0xbb   :  { %v606_v38 = vadd.f32 %v1173_v16, %v486_v35 }
  0xbc   :  { %v607_v39 = vadd.f32 %v1167_v11, %v402_v37 }
  0xbd   :  { %632 = vst [vmem:[%s1278_s3 + $0x28] sm:$0xff] %v606_v38 }
  0xbe   :  { %633 = vst [vmem:[%s1278_s3 + $0x30] sm:$0xff] %v607_v39 }
  0xbf   :  { %v444_v40 = vpop.f32.mrf.mxu2 }
  0xc0   :  { %v487_v41 = vpop.f32.mrf.mxu3  ;;  %v361_v42 = vpop.f32.mrf.mxu0 }
  0xc1   :  { %v488_v43 = vadd.f32 %v487_v41, %v444_v40  ;;  %v404_v44 = vpop.f32.mrf.mxu1 }
  0xc2   :  { %v405_v45 = vadd.f32 %v404_v44, %v361_v42 }
  0xc3   :  { %v608_v46 = vadd.f32 %v1173_v16, %v488_v43 }
  0xc4   :  { %v609_v47 = vadd.f32 %v1167_v11, %v405_v45 }
  0xc5   :  { %634 = vst [vmem:[%s1278_s3 + $0x38] sm:$0xff] %v608_v46 }
  0xc6   :  { %635 = vst [vmem:[%s1278_s3 + $0x40] sm:$0xff] %v609_v47 }
  0xc7   :  { %v447_v48 = vpop.f32.mrf.mxu2 }
  0xc8   :  { %v490_v49 = vpop.f32.mrf.mxu3  ;;  %v363_v50 = vpop.f32.mrf.mxu0 }
  0xc9   :  { %v491_v51 = vadd.f32 %v490_v49, %v447_v48  ;;  %v406_v52 = vpop.f32.mrf.mxu1 }
  0xca   :  { %v407_v53 = vadd.f32 %v406_v52, %v363_v50 }
  0xcb   :  { %v610_v54 = vadd.f32 %v1173_v16, %v491_v51 }
  0xcc   :  { %v611_v55 = vadd.f32 %v1167_v11, %v407_v53 }
  0xcd   :  { %636 = vst [vmem:[%s1278_s3 + $0x48] sm:$0xff] %v610_v54 }
  0xce   :  { %637 = vst [vmem:[%s1278_s3 + $0x50] sm:$0xff] %v611_v55 }
  0xcf   :  { %v449_v56 = vpop.f32.mrf.mxu2 }
  0xd0   :  { %v492_v57 = vpop.f32.mrf.mxu3  ;;  %v366_v58 = vpop.f32.mrf.mxu0 }
  0xd1   :  { %v493_v59 = vadd.f32 %v492_v57, %v449_v56  ;;  %v409_v60 = vpop.f32.mrf.mxu1 }
  0xd2   :  { %v410_v61 = vadd.f32 %v409_v60, %v366_v58 }
  0xd3   :  { %v612_v62 = vadd.f32 %v1173_v16, %v493_v59 }
  0xd4   :  { %v613_v63 = vadd.f32 %v1167_v11, %v410_v61 }
  0xd5   :  { %638 = vst [vmem:[%s1278_s3 + $0x58] sm:$0xff] %v612_v62 }
  0xd6   :  { %639 = vst [vmem:[%s1278_s3 + $0x60] sm:$0xff] %v613_v63 }
  0xd7   :  { %v452_v0 = vpop.f32.mrf.mxu2 }
  0xd8   :  { %v495_v1 = vpop.f32.mrf.mxu3  ;;  %v368_v2 = vpop.f32.mrf.mxu0 }
  0xd9   :  { %v496_v3 = vadd.f32 %v495_v1, %v452_v0  ;;  %v411_v4 = vpop.f32.mrf.mxu1 }
  0xda   :  { %v412_v5 = vadd.f32 %v411_v4, %v368_v2 }
  0xdb   :  { %v614_v6 = vadd.f32 %v1173_v16, %v496_v3 }
  0xdc   :  { %v615_v7 = vadd.f32 %v1167_v11, %v412_v5 }
  0xdd   :  { %640 = vst [vmem:[%s1278_s3 + $0x68] sm:$0xff] %v614_v6 }
  0xde   :  { %641 = vst [vmem:[%s1278_s3 + $0x70] sm:$0xff] %v615_v7 }
  0xdf   :  { %v454_v8 = vpop.f32.mrf.mxu2 }
  0xe0   :  { %v497_v9 = vpop.f32.mrf.mxu3  ;;  %v371_v10 = vpop.f32.mrf.mxu0 }
  0xe1   :  { %v498_v12 = vadd.f32 %v497_v9, %v454_v8  ;;  %v414_v13 = vpop.f32.mrf.mxu1 }
  0xe2   :  { %v415_v14 = vadd.f32 %v414_v13, %v371_v10 }
  0xe3   :  { %v616_v15 = vadd.f32 %v1173_v16, %v498_v12 }
  0xe4   :  { %v617_v17 = vadd.f32 %v1167_v11, %v415_v14 }
  0xe5   :  { %642 = vst [vmem:[%s1278_s3 + $0x78] sm:$0xff] %v616_v15 }
  0xe6   :  { %643 = vst [vmem:[%s1278_s3 + $0x80] sm:$0xff] %v617_v17 }
  0xe7   :  { %v457_v18 = vpop.f32.mrf.mxu2 }
  0xe8   :  { %v500_v19 = vpop.f32.mrf.mxu3  ;;  %v373_v20 = vpop.f32.mrf.mxu0 }
  0xe9   :  { %v501_v21 = vadd.f32 %v500_v19, %v457_v18  ;;  %v416_v22 = vpop.f32.mrf.mxu1 }
  0xea   :  { %v417_v23 = vadd.f32 %v416_v22, %v373_v20 }
  0xeb   :  { %v618_v24 = vadd.f32 %v1173_v16, %v501_v21 }
  0xec   :  { %v619_v25 = vadd.f32 %v1167_v11, %v417_v23 }
  0xed   :  { %644 = vst [vmem:[%s1278_s3 + $0x88] sm:$0xff] %v618_v24 }
  0xee   :  { %645 = vst [vmem:[%s1278_s3 + $0x90] sm:$0xff] %v619_v25 }
  0xef   :  { %v459_v26 = vpop.f32.mrf.mxu2 }
  0xf0   :  { %v502_v27 = vpop.f32.mrf.mxu3  ;;  %v376_v28 = vpop.f32.mrf.mxu0 }
  0xf1   :  { %v503_v29 = vadd.f32 %v502_v27, %v459_v26  ;;  %v419_v30 = vpop.f32.mrf.mxu1 }
  0xf2   :  { %v420_v31 = vadd.f32 %v419_v30, %v376_v28 }
  0xf3   :  { %v620_v32 = vadd.f32 %v1173_v16, %v503_v29 }
  0xf4   :  { %v621_v33 = vadd.f32 %v1167_v11, %v420_v31 }
  0xf5   :  { %646 = vst [vmem:[%s1278_s3 + $0x98] sm:$0xff] %v620_v32 }
  0xf6   :  { %647 = vst [vmem:[%s1278_s3 + $0xa0] sm:$0xff] %v621_v33 }
  0xf7   :  { %v462_v34 = vpop.f32.mrf.mxu2 }
  0xf8   :  { %v505_v35 = vpop.f32.mrf.mxu3  ;;  %v378_v36 = vpop.f32.mrf.mxu0 }
  0xf9   :  { %v506_v37 = vadd.f32 %v505_v35, %v462_v34  ;;  %v421_v38 = vpop.f32.mrf.mxu1 }
  0xfa   :  { %v422_v39 = vadd.f32 %v421_v38, %v378_v36 }
  0xfb   :  { %v622_v40 = vadd.f32 %v1173_v16, %v506_v37 }
  0xfc   :  { %v623_v41 = vadd.f32 %v1167_v11, %v422_v39 }
  0xfd   :  { %648 = vst [vmem:[%s1278_s3 + $0xa8] sm:$0xff] %v622_v40 }
  0xfe   :  { %649 = vst [vmem:[%s1278_s3 + $0xb0] sm:$0xff] %v623_v41 }
  0xff   :  { %v464_v42 = vpop.f32.mrf.mxu2 }
 0x100   :  { %v507_v43 = vpop.f32.mrf.mxu3  ;;  %v381_v44 = vpop.f32.mrf.mxu0 }
 0x101   :  { %v508_v45 = vadd.f32 %v507_v43, %v464_v42  ;;  %v424_v46 = vpop.f32.mrf.mxu1 }
 0x102   :  { %v425_v47 = vadd.f32 %v424_v46, %v381_v44 }
 0x103   :  { %v624_v48 = vadd.f32 %v1173_v16, %v508_v45 }
 0x104   :  { %v625_v49 = vadd.f32 %v1167_v11, %v425_v47 }
 0x105   :  { %650 = vst [vmem:[%s1278_s3 + $0xb8] sm:$0xff] %v624_v48 }
 0x106   :  { %651 = vst [vmem:[%s1278_s3 + $0xc0] sm:$0xff] %v625_v49 }
 0x107   :  { %v467_v50 = vpop.f32.mrf.mxu2 }
 0x108   :  { %v510_v51 = vpop.f32.mrf.mxu3  ;;  %v383_v52 = vpop.f32.mrf.mxu0 }
 0x109   :  { %v511_v53 = vadd.f32 %v510_v51, %v467_v50  ;;  %v426_v54 = vpop.f32.mrf.mxu1 }
 0x10b   :  { %v626_v55 = vadd.f32 %v1173_v16, %v511_v53 }
 0x10d   :  { %652 = vst [vmem:[%s1278_s3 + $0xc8] sm:$0xff] %v626_v55 }
 0x10f   :  { %v469_v11 = vpop.f32.mrf.mxu2 }
 0x110   :  { %v512_v56 = vpop.f32.mrf.mxu3 }

// kernel: attention_pool_2d.10
= control target key start
LH: loop header
LB: loop body
LE: loop exit
PB: predicated region body
PF: predicated region fallthrough
CT: control target
= control target key end

     0   :  { %s873_s12 = smov 0   ;;  %s1076_s0 = inlined_call_operand.vmem [shape: f32[2,1,256], index: 0, kind: input, shape index: {}]   ;;  %s1077_s1 = inlined_call_operand.vmem [shape: f32[2,50,256], index: 1, kind: input, shape index: {}]   ;;  %s1078_s2 = inlined_call_operand.vmem [shape: f32[2,50,256], index: 2, kind: input, shape index: {}]   ;;  %s1079_s3 = inlined_call_operand.vmem [shape: f32[2,1,256], index: 3, kind: output, shape index: {}]  }
   0x1 LB: > { %s737_s13 = sadd.s32 4294967295, %s850_s12   ;;  %p741_p0 = scmp.ge.s32.totalorder %s850_s12, 1  ;;  %s850_s12 = sphi %s873_s12, %s13_s12  }
   0x2   : > { %p156_p1 = scmp.lt.s32.totalorder %s850_s12, 3 }
   0x4   : > { %p157_p2 = pnand %p741_p0, %p156_p1 }
   0x5   : > { %p188_p3 = scmp.lt.s32.totalorder (!%p157_p2), %s737_s13, 1  ;;  %s852_s18 = smov (!%p157_p2), 64  }
   0x6   : > { %160 = sbr.rel (%p157_p2) target bundleno = 974 (0x3ce), region = 32 }
   0xb   : > { %s1081_s13 = smov (!%p188_p3, %s737_s13), 1  ;;  %vm236_vm0 = vcmask 523264   ;;  %vm281_vm1 = vcmask 401408   ;;  %vm297_vm2 = vcmask 1041408   ;;  %vm293_vm3 = vcmask 408576  }
   0xc   : > { %s788_s14 = smul.u32 112, %s1081_s13  ;;  %s742_s19 = sshll.u32 %s1081_s13, 1  ;;  %vm652_vm4 = vcmask 1040384  }
   0xd   : > { %s191_s22 = scalar_lea.vmem %s1076_s0, %s742_s19  ;;  %s205_s28 = scalar_lea.vmem %s1079_s3, %s742_s19 }
   0xe   : > { %s889_s17 = scalar_lea.vmem %s1077_s1, %s788_s14  ;;  %v934_v10 = vld [vmem:[%s191_s22] sm:$0x3]  ;;  %s978_s25 = scalar_lea.vmem %s1078_s2, %s788_s14 }
   0xf   : > { %v219_v0 = vld [vmem:[%s889_s17 + $0x60] sm:$0x3]  ;;  %v217_v1 = vld [vmem:[%s889_s17 + $0x50] sm:$0xff]  ;;  %v900_v3 = vld [vmem:[%s889_s17 + $0x68] sm:$0x3]  ;;  %v235_v13 = vmul.f32 0.125, %v934_v10 }
  0x10   : > { %746 = vmatpush.xpose.msk.msra.mxu0 %vm236_vm0, %v219_v0  ;;  %v215_v2 = vld [vmem:[%s889_s17 + $0x40] sm:$0xff]  ;;  %334 = vrot.lane.b32.xlu1 %v217_v1, %s852_s18  ;;  %v903_v4 = vld [vmem:[%s889_s17 + $0x58] sm:$0xff]  ;;  %v209_v5 = vld [vmem:[%s889_s17 + $0x10] sm:$0xff]  ;;  %v437_v56 = vrot.slane %v934_v10, 1 }
  0x11   : > { %336 = vrot.lane.b32.xlu0 %v219_v0, %s852_s18  ;;  %332 = vrot.lane.b32.xlu2 %v215_v2, %s852_s18  ;;  %v213_v6 = vld [vmem:[%s889_s17 + $0x30] sm:$0xff]  ;;  %v211_v7 = vld [vmem:[%s889_s17 + $0x20] sm:$0xff]  ;;  %v321_v15 = vperm.slane %v235_v13, 0 }
  0x12   : > { %v917_v8 = vld [vmem:[%s889_s17 + $0x18] sm:$0xff]  ;;  %v920_v9 = vld [vmem:[%s889_s17 + $0x48] sm:$0xff]  ;;  %v207_v11 = vld [vmem:[%s889_s17] sm:$0xff]  ;;  %v439_v58 = vmul.f32 0.125, %v437_v56 }
  0x13   : > { %v938_v12 = vld [vmem:[%s889_s17 + $0x38] sm:$0xff]  ;;  %v947_v14 = vld [vmem:[%s889_s17 + $0x28] sm:$0xff]  ;;  %v233_v40 = vld [vmem:[%s978_s25 + $0x60] sm:$0x3] }
  0x14   : > { %747 = vmatpush.xpose.msk.msra.mxu0 %vm236_vm0, %v217_v1  ;;  %v208_v28 = vld [vmem:[%s889_s17 + $0x8] sm:$0xff]  ;;  %v982_v41 = vld [vmem:[%s978_s25 + $0x50] sm:$0xff]  ;;  %754 = vmatpush.msk.msra.mxu1 %vm297_vm2, %v233_v40  ;;  %v229_v42 = vld [vmem:[%s978_s25 + $0x40] sm:$0xff] }
  0x15   : > { %v227_v45 = vld [vmem:[%s978_s25 + $0x30] sm:$0xff]  ;;  %v225_v46 = vld [vmem:[%s978_s25 + $0x20] sm:$0xff]  ;;  %v1009_v53 = vld [vmem:[%s978_s25 + $0x68] sm:$0x3] }
  0x16   : > { %311 = vmatpush.msra.mxu1 %v982_v41  ;;  %v223_v47 = vld [vmem:[%s978_s25 + $0x10] sm:$0xff]  ;;  %v221_v48 = vld [vmem:[%s978_s25] sm:$0xff]  ;;  %v1014_v55 = vld [vmem:[%s978_s25 + $0x48] sm:$0xff] }
  0x17   : > { %v803_v57 = vpack.i.bf16 %v229_v42, %v1014_v55  ;;  %v1021_v59 = vld [vmem:[%s978_s25 + $0x38] sm:$0xff]  ;;  %v1028_v63 = vld [vmem:[%s978_s25 + $0x28] sm:$0xff] }
  0x18   : > { %748 = vmatpush.xpose.msk.msra.mxu0 %vm236_vm0, %v215_v2  ;;  %538 = vrot.lane.b32.xlu1 %v900_v3, %s852_s18  ;;  %v808_v60 = vpack.i.bf16 %v227_v45, %v1021_v59  ;;  %v813_v0 = vpack.i.bf16 %v225_v46, %v1028_v63  ;;  %v1033_v1 = vld [vmem:[%s978_s25 + $0x18] sm:$0xff] }
  0x19   : > { %326 = vrot.lane.b32.xlu0 %v209_v5, %s852_s18  ;;  %536 = vrot.lane.b32.xlu2 %v903_v4, %s852_s18  ;;  %v818_v2 = vpack.i.bf16 %v223_v47, %v1033_v1 }
  0x1a   : > { %312 = vmatpush.msra.mxu1 %v229_v42 }
  0x1c   : > { %749 = vmatpush.xpose.msk.msra.mxu0 %vm236_vm0, %v213_v6  ;;  %313 = vmatpush.msra.mxu1 %v227_v45 }
  0x1e   : > { %314 = vmatpush.msra.mxu1 %v225_v46 }
  0x20   : > { %750 = vmatpush.xpose.msk.msra.mxu0 %vm236_vm0, %v211_v7  ;;  %330 = vrot.lane.b32.xlu1 %v213_v6, %s852_s18 }
  0x21   : > { %528 = vrot.lane.b32.xlu0 %v917_v8, %s852_s18  ;;  %534 = vrot.lane.b32.xlu2 %v920_v9, %s852_s18 }
  0x22   : > { %315 = vmatpush.msra.mxu1 %v223_v47 }
  0x24   : > { %751 = vmatpush.xpose.msk.msra.mxu0 %vm236_vm0, %v209_v5  ;;  %316 = vmatpush.msra.mxu1 %v221_v48 }
  0x26   : > { %766 = vmatpush.xpose.msk.msrb.mxu1 %vm236_vm0, %v900_v3  ;;  %v1038_v3 = vld [vmem:[%s978_s25 + $0x8] sm:$0xff] }
  0x28   : > { %752 = vmatpush.xpose.msk.msra.mxu0 %vm236_vm0, %v207_v11  ;;  %328 = vrot.lane.b32.xlu1 %v211_v7, %s852_s18 }
  0x29   : > { %532 = vrot.lane.b32.xlu2 %v938_v12, %s852_s18 }
  0x2a   : > { %767 = vmatpush.xpose.msk.msrb.mxu1 %vm236_vm0, %v903_v4  ;;  %v823_v4 = vpack.i.bf16 %v221_v48, %v1038_v3 }
  0x2b   : > { %753 = vmatmul.msk.f32.vlgmr.msra.gmra.mxu0 %vm236_vm0, %v235_v13  ;;  %v232_v13 = vld [vmem:[%s978_s25 + $0x58] sm:$0xff] }
  0x2e   : > { %768 = vmatpush.xpose.msk.msrb.mxu1 %vm236_vm0, %v920_v9 }
  0x30   : > { %530 = vrot.lane.b32.xlu1 %v947_v14, %s852_s18 }
  0x31   : > { %324 = vrot.lane.b32.xlu2 %v207_v11, %s852_s18 }
  0x32   : > { %769 = vmatpush.xpose.msk.msrb.mxu1 %vm236_vm0, %v938_v12 }
  0x36   : > { %770 = vmatpush.xpose.msk.msrb.mxu1 %vm236_vm0, %v947_v14  ;;  %v798_v14 = vpack.i.bf16 %v982_v41, %v232_v13 }
  0x38   : > { %322 = vrot.lane.b32.xlu1 %v321_v15, %s852_s18 }
  0x39   : > { %521 = vrot.lane.b32.xlu2 %v934_v10, %s852_s18 }
  0x3a   : > { %771 = vmatpush.xpose.msk.msrb.mxu1 %vm236_vm0, %v917_v8 }
  0x3e   : > { %772 = vmatpush.xpose.msk.msrb.mxu1 %vm236_vm0, %v208_v28 }
  0x6b   : > { %v333_v17 = vpop.permute.xlu2 %332 }
  0x73   : > { %v537_v20 = vpop.permute.xlu2 %536 }
  0x7b   : > { %v535_v24 = vpop.permute.xlu2 %534 }
  0x82   : > { %v335_v16 = vpop.permute.xlu1 %334 }
  0x83   : > { %v337_v18 = vpop.permute.xlu0 %336  ;;  %v533_v27 = vpop.permute.xlu2 %532 }
  0x84   : > { %756 = vmatpush.xpose.msk.msra.mxu2 %vm236_vm0, %v337_v18 }
  0x88   : > { %757 = vmatpush.xpose.msk.msra.mxu2 %vm236_vm0, %v335_v16 }
  0x8a   : > { %v539_v19 = vpop.permute.xlu1 %538 }
  0x8b   : > { %776 = vmatpush.xpose.msk.msrb.mxu0 %vm236_vm0, %v539_v19  ;;  %v327_v25 = vpop.permute.xlu0 %326  ;;  %v325_v30 = vpop.permute.xlu2 %324 }
  0x8c   : > { %758 = vmatpush.xpose.msk.msra.mxu2 %vm236_vm0, %v333_v17 }
  0x8f   : > { %777 = vmatpush.xpose.msk.msrb.mxu0 %vm236_vm0, %v537_v20 }
  0x92   : > { %v331_v23 = vpop.permute.xlu1 %330 }
  0x93   : > { %759 = vmatpush.xpose.msk.msra.mxu2 %vm236_vm0, %v331_v23  ;;  %778 = vmatpush.xpose.msk.msrb.mxu0 %vm236_vm0, %v535_v24  ;;  %v529_v31 = vpop.permute.xlu0 %528  ;;  %v522_v38 = vpop.permute.xlu2 %521 }
  0x94   : > { %v523_v39 = vrot.slane %v522_v38, 1 }
  0x96   : > { %v525_v43 = vmul.f32 0.125, %v523_v39 }
  0x97   : > { %779 = vmatpush.xpose.msk.msrb.mxu0 %vm236_vm0, %v533_v27 }
  0x9a   : > { %v329_v26 = vpop.permute.xlu1 %328 }
  0x9b   : > { %760 = vmatpush.xpose.msk.msra.mxu2 %vm236_vm0, %v329_v26 }
  0x9f   : > { %761 = vmatpush.xpose.msk.msra.mxu2 %vm236_vm0, %v327_v25 }
  0xa2   : > { %v531_v29 = vpop.permute.xlu1 %530 }
  0xa3   : > { %780 = vmatpush.xpose.msk.msrb.mxu0 %vm236_vm0, %v531_v29  ;;  %762 = vmatpush.xpose.msk.msra.mxu2 %vm236_vm0, %v325_v30 }
  0xa7   : > { %781 = vmatpush.xpose.msk.msrb.mxu0 %vm236_vm0, %v529_v31 }
  0xa8   : > { %v278_v21 = vpop.f32.mrf.mxu0 }
  0xa9   : > { %v282_v22 = vsel %vm281_vm1, %v278_v21, -inf }
  0xaa   : > { %283 = vmax.xlane.f32.xlu0 %v282_v22  ;;  %v323_v32 = vpop.permute.xlu1 %322 }
  0xab   : > { %763 = vmatmul.msk.f32.vlgmr.msra.gmra.mxu2 %vm236_vm0, %v323_v32 }
  0xbe   : > { %526 = vrot.lane.b32.xlu0 %v208_v28, %s852_s18 }
 0x11d   : > { %v284_v33 = vpop.xlane.xlu0 %283 }
 0x11e   : > { %v285_v34 = vsub.f32 %v278_v21, %v284_v33 }
 0x120   : > { %v286_v35 = vmul.f32 1.442695, %v285_v34 }
 0x122   : > { %828 = vpow2.f32 %v286_v35 }
 0x128   : > { %v829_v36 = vpop.eup %828 }
 0x129   : > { %v288_v37 = vsel %vm281_vm1, %v829_v36, 0.0 }
 0x12a   : > { %289 = vadd.xlane.f32.xlu1 %v288_v37 }
 0x12e   : > { %v371_v49 = vpop.f32.mrf.mxu2 }
 0x12f   : > { %v374_v50 = vsel %vm281_vm1, %v371_v49, -inf }
 0x130   : > { %v527_v44 = vpop.permute.xlu0 %526  ;;  %375 = vmax.xlane.f32.xlu0 %v374_v50 }
 0x131   : > { %782 = vmatpush.xpose.msk.msrb.mxu0 %vm236_vm0, %v527_v44 }
 0x134   : > { %783 = vmatmul.msk.f32.vlgmr.msrb.gmra.mxu0 %vm236_vm0, %v525_v43 }
 0x143   : > { %606 = vrot.lane.b32.xlu1 %v1009_v53, %s852_s18 }
 0x144   : > { %403 = vrot.lane.b32.xlu0 %v233_v40, %s852_s18 }
 0x14b   : > { %804 = vrot.lane.b32.xlu1 %v803_v57, %s852_s18 }
 0x153   : > { %809 = vrot.lane.b32.xlu1 %v808_v60, %s852_s18 }
 0x15b   : > { %814 = vrot.lane.b32.xlu1 %v813_v0, %s852_s18 }
 0x163   : > { %819 = vrot.lane.b32.xlu1 %v818_v2, %s852_s18 }
 0x16b   : > { %824 = vrot.lane.b32.xlu1 %v823_v4, %s852_s18 }
 0x19d   : > { %v290_v51 = vpop.xlane.xlu1 %289 }
 0x19e   : > { %830 = vrcp.f32 %v290_v51 }
 0x1a3   : > { %v376_v15 = vpop.xlane.xlu0 %375 }
 0x1a4   : > { %v831_v52 = vpop.eup %830  ;;  %v377_v18 = vsub.f32 %v371_v49, %v376_v15 }
 0x1a5   : > { %v292_v54 = vmul.f32 %v831_v52, %v829_v36 }
 0x1a6   : > { %v378_v19 = vmul.f32 1.442695, %v377_v18 }
 0x1a7   : > { %755 = vmatmul.msk.f32.vlgmr.msra.gmra.mxu1 %vm293_vm3, %v292_v54 }
 0x1af   : > { %773 = vmatmul.msk.f32.vlgmr.msrb.gmra.mxu1 %vm236_vm0, %v439_v58  ;;  %v655_v58 = vlaneseq }
 0x1b1   : > { %v574_v61 = vpop.f32.mrf.mxu0  ;;  %vm657_vm5 = vcmp.lt.s32.totalorder %v655_v58, 256 }
 0x1b2   : > { %v577_v62 = vsel %vm281_vm1, %v574_v61, -inf }
 0x1b3   : > { %578 = vmax.xlane.f32.xlu2 %v577_v62 }
 0x1b5   : > { %v607_v16 = vpop.permute.xlu1 %606 }
 0x1b6   : > { %v404_v17 = vpop.permute.xlu0 %403  ;;  %784 = vmatpush.msk.msrb.mxu2 %vm297_vm2, %v607_v16 }
 0x1b7   : > { %764 = vmatpush.msk.msra.mxu3 %vm297_vm2, %v404_v17 }
 0x1bd   : > { %v805_v22 = vpop.permute.xlu1 %804 }
 0x1be   : > { %v806_v33 = vunpack.i.l.bf16 %v805_v22  ;;  %v807_v34 = vunpack.i.h.bf16 %v805_v22 }
 0x1c5   : > { %v810_v23 = vpop.permute.xlu1 %809 }
 0x1c6   : > { %v811_v36 = vunpack.i.l.bf16 %v810_v23  ;;  %v812_v38 = vunpack.i.h.bf16 %v810_v23 }
 0x1cd   : > { %v815_v24 = vpop.permute.xlu1 %814 }
 0x1ce   : > { %v816_v39 = vunpack.i.l.bf16 %v815_v24  ;;  %v817_v41 = vunpack.i.h.bf16 %v815_v24 }
 0x1d5   : > { %v820_v28 = vpop.permute.xlu1 %819 }
 0x1d6   : > { %v821_v42 = vunpack.i.l.bf16 %v820_v28  ;;  %v822_v43 = vunpack.i.h.bf16 %v820_v28 }
 0x1dd   : > { %v825_v40 = vpop.permute.xlu1 %824 }
 0x1de   : > { %v826_v45 = vunpack.i.l.bf16 %v825_v40  ;;  %v827_v46 = vunpack.i.h.bf16 %v825_v40 }
 0x224   : > { %v1042_v5 = vpop.f32.mrf.mxu1 }
 0x226   : > { %v579_v6 = vpop.xlane.xlu2 %578 }
 0x227   : > { %v580_v7 = vsub.f32 %v574_v61, %v579_v6 }
 0x229   : > { %v581_v8 = vmul.f32 1.442695, %v580_v7 }
 0x22b   : > { %832 = vpow2.f32 %v581_v8 }
 0x22c   : > { %v481_v9 = vpop.f32.mrf.mxu1  ;;  %834 = vpow2.f32 %v378_v19 }
 0x22d   : > { %v484_v10 = vsel %vm281_vm1, %v481_v9, -inf }
 0x22e   : > { %485 = vmax.xlane.f32.xlu2 %v484_v10 }
 0x231   : > { %v833_v11 = vpop.eup %832 }
 0x232   : > { %v583_v12 = vsel %vm281_vm1, %v833_v11, 0.0  ;;  %v835_v20 = vpop.eup %834 }
 0x233   : > { %584 = vadd.xlane.f32.xlu0 %v583_v12  ;;  %v380_v21 = vsel %vm281_vm1, %v835_v20, 0.0 }
 0x246   : > { %799 = vrot.lane.b32.xlu2 %v798_v14, %s852_s18 }
 0x26f   : > { %381 = vadd.xlane.f32.xlu2 %v380_v21 }
 0x2a1   : > { %v486_v25 = vpop.xlane.xlu2 %485 }
 0x2a2   : > { %v487_v26 = vsub.f32 %v481_v9, %v486_v25 }
 0x2a4   : > { %v488_v27 = vmul.f32 1.442695, %v487_v26 }
 0x2a6   : > { %836 = vpow2.f32 %v488_v27  ;;  %v585_v29 = vpop.xlane.xlu0 %584 }
 0x2a7   : > { %838 = vrcp.f32 %v585_v29 }
 0x2a9   : > { %v800_v30 = vpop.permute.xlu2 %799 }
 0x2aa   : > { %v802_v31 = vunpack.i.h.bf16 %v800_v30  ;;  %v801_v32 = vunpack.i.l.bf16 %v800_v30 }
 0x2ac   : > { %v837_v35 = vpop.eup %836  ;;  %426 = vmatpush.msra.mxu3 %v802_v31  ;;  %629 = vmatpush.msrb.mxu2 %v801_v32 }
 0x2ad   : > { %v490_v37 = vsel %vm281_vm1, %v837_v35, 0.0  ;;  %v839_v44 = vpop.eup %838 }
 0x2ae   : > { %491 = vadd.xlane.f32.xlu1 %v490_v37  ;;  %630 = vmatpush.msrb.mxu2 %v806_v33  ;;  %v587_v47 = vmul.f32 %v839_v44, %v833_v11 }
 0x2af   : > { %427 = vmatpush.msra.mxu3 %v807_v34 }
 0x2b0   : > { %631 = vmatpush.msrb.mxu2 %v811_v36 }
 0x2b1   : > { %428 = vmatpush.msra.mxu3 %v812_v38 }
 0x2b2   : > { %632 = vmatpush.msrb.mxu2 %v816_v39 }
 0x2b3   : > { %429 = vmatpush.msra.mxu3 %v817_v41 }
 0x2b4   : > { %633 = vmatpush.msrb.mxu2 %v821_v42 }
 0x2b5   : > { %430 = vmatpush.msra.mxu3 %v822_v43 }
 0x2b6   : > { %634 = vmatpush.msrb.mxu2 %v826_v45 }
 0x2b7   : > { %785 = vmatmul.msk.f32.vlgmr.msrb.gmra.mxu2 %vm293_vm3, %v587_v47  ;;  %431 = vmatpush.msra.mxu3 %v827_v46 }
 0x2b9   : > { %774 = vmatpush.msk.msrb.mxu3 %vm297_vm2, %v1009_v53 }
 0x2bb   : > { %511 = vmatpush.msrb.mxu3 %v232_v13 }
 0x2bd   : > { %512 = vmatpush.msrb.mxu3 %v1014_v55 }
 0x2bf   : > { %513 = vmatpush.msrb.mxu3 %v1021_v59 }
 0x2c1   : > { %514 = vmatpush.msrb.mxu3 %v1028_v63 }
 0x2c3   : > { %515 = vmatpush.msrb.mxu3 %v1033_v1 }
 0x2c5   : > { %516 = vmatpush.msrb.mxu3 %v1038_v3 }
 0x2e2   : > { %v382_v48 = vpop.xlane.xlu2 %381 }
 0x2e3   : > { %840 = vrcp.f32 %v382_v48 }
 0x2e9   : > { %v841_v49 = vpop.eup %840 }
 0x2ea   : > { %v384_v50 = vmul.f32 %v841_v49, %v835_v20 }
 0x2ec   : > { %765 = vmatmul.msk.f32.vlgmr.msra.gmra.mxu3 %vm293_vm3, %v384_v50 }
 0x321   : > { %v492_v51 = vpop.xlane.xlu1 %491 }
 0x322   : > { %842 = vrcp.f32 %v492_v51 }
 0x328   : > { %v843_v52 = vpop.eup %842 }
 0x329   : > { %v494_v53 = vmul.f32 %v843_v52, %v837_v35 }
 0x32b   : > { %775 = vmatmul.msk.f32.vlgmr.msrb.gmra.mxu3 %vm293_vm3, %v494_v53 }
 0x33a   : > { %v636_v54 = vpop.f32.mrf.mxu2 }
 0x33b   : > { %644 = vrot.lane.b32.xlu0 %v636_v54, %s852_s18 }
 0x36f   : > { %v433_v55 = vpop.f32.mrf.mxu3 }
 0x370   : > { %640 = vrot.lane.b32.xlu2 %v433_v55, %s852_s18 }
 0x3ad   : > { %v645_v56 = vpop.permute.xlu0 %644 }
 0x3ae   : > { %v518_v57 = vpop.f32.mrf.mxu3 }
 0x3af   : > { %v648_v59 = vsel %vm236_vm0, %v518_v57, %v645_v56 }
 0x3b0   : > { %v651_v60 = vrot.slane %v648_v59, 7 }
 0x3ca   : > { %v641_v61 = vpop.permute.xlu2 %640 }
 0x3cb   : > { %v647_v62 = vsel %vm236_vm0, %v1042_v5, %v641_v61 }
 0x3cc   : > { %v653_v63 = vsel %vm652_vm4, %v647_v62, %v651_v60 }
 0x3cd   : > { %659 = vst.msk [vmem:[%s205_s28] sm:$0x3] %vm657_vm5, %v653_v63 }
 0x3ce PF: > { %s13_s12 = sadd.s32 1, %s850_s12  }
 0x3cf   : > { %p10_p4 = scmp.ge.s32.totalorder %s13_s12, 4  }
 0x3d1   :  { %12 = sbr.rel (!%p10_p4) target bundleno = 1 (0x1), region = 68 }

// kernel: attention_pool_2d.11
= control target key start
LH: loop header
LB: loop body
LE: loop exit
PB: predicated region body
PF: predicated region fallthrough
CT: control target
= control target key end

     0   :  { %s356_s1 = inlined_call_operand.vmem [shape: bf16[256,128], index: 1, kind: input, shape index: {}]   ;;  %s357_s0 = inlined_call_operand.vmem [shape: bf16[8,256], index: 0, kind: input, shape index: {}]   ;;  %s358_s2 = inlined_call_operand.vmem [shape: f32[1,128], index: 2, kind: input, shape index: {}]   ;;  %s359_s3 = inlined_call_operand.vmem [shape: f32[8,128], index: 3, kind: output, shape index: {}]  }
   0x1   :  { %v269_v0 = vld [vmem:[%s356_s1 + $0x38] sm:$0xff]  ;;  %v268_v2 = vld [vmem:[%s356_s1 + $0x30] sm:$0xff]  ;;  %v267_v4 = vld [vmem:[%s356_s1 + $0x28] sm:$0xff] }
   0x2   :  { %v277_v1 = vld [vmem:[%s356_s1 + $0x78] sm:$0xff]  ;;  %156 = vmatpush.bf16.msra.mxu0 %v269_v0  ;;  %v276_v3 = vld [vmem:[%s356_s1 + $0x70] sm:$0xff]  ;;  %v275_v5 = vld [vmem:[%s356_s1 + $0x68] sm:$0xff] }
   0x3   :  { %169 = vmatpush.bf16.msra.mxu1 %v277_v1  ;;  %v266_v6 = vld [vmem:[%s356_s1 + $0x20] sm:$0xff]  ;;  %v265_v8 = vld [vmem:[%s356_s1 + $0x18] sm:$0xff]  ;;  %v264_v10 = vld [vmem:[%s356_s1 + $0x10] sm:$0xff] }
   0x4   :  { %v274_v7 = vld [vmem:[%s356_s1 + $0x60] sm:$0xff]  ;;  %v273_v9 = vld [vmem:[%s356_s1 + $0x58] sm:$0xff]  ;;  %v272_v11 = vld [vmem:[%s356_s1 + $0x50] sm:$0xff] }
   0x5   :  { %v263_v12 = vld [vmem:[%s356_s1 + $0x8] sm:$0xff]  ;;  %v20_v14 = vld [vmem:[%s357_s0] sm:$0xff] }
   0x6   :  { %157 = vmatpush.bf16.msra.mxu0 %v268_v2  ;;  %v271_v13 = vld [vmem:[%s356_s1 + $0x48] sm:$0xff]  ;;  %v54_v15 = vunpack.c.l.b16 %v20_v14  ;;  %v55_v16 = vunpack.c.h.b16 %v20_v14  ;;  %v262_v17 = vld [vmem:[%s356_s1] sm:$0xff] }
   0x7   :  { %170 = vmatpush.bf16.msra.mxu1 %v276_v3  ;;  %v270_v18 = vld [vmem:[%s356_s1 + $0x40] sm:$0xff] }
   0x8   :  { %v56_v19 = vpack.c.b16 %v54_v15, %v54_v15  ;;  %v57_v20 = vpack.c.b16 %v55_v16, %v55_v16  ;;  %v278_v21 = vld [vmem:[%s358_s2] ss:$0 sm:$0xff] }
   0xa   :  { %158 = vmatpush.bf16.msra.mxu0 %v267_v4 }
   0xb   :  { %171 = vmatpush.bf16.msra.mxu1 %v275_v5 }
   0xe   :  { %159 = vmatpush.bf16.msra.mxu0 %v266_v6 }
   0xf   :  { %172 = vmatpush.bf16.msra.mxu1 %v274_v7 }
  0x12   :  { %160 = vmatpush.bf16.msra.mxu0 %v265_v8 }
  0x13   :  { %173 = vmatpush.bf16.msra.mxu1 %v273_v9 }
  0x16   :  { %161 = vmatpush.bf16.msra.mxu0 %v264_v10 }
  0x17   :  { %174 = vmatpush.bf16.msra.mxu1 %v272_v11 }
  0x1a   :  { %162 = vmatpush.bf16.msra.mxu0 %v263_v12 }
  0x1b   :  { %175 = vmatpush.bf16.msra.mxu1 %v271_v13 }
  0x1e   :  { %163 = vmatpush.bf16.msra.mxu0 %v262_v17 }
  0x1f   :  { %176 = vmatpush.bf16.msra.mxu1 %v270_v18 }
  0x21   :  { %164 = vmatmul.bf16.vlgmr.msra.gmra.mxu0 %v56_v19 }
  0x22   :  { %177 = vmatmul.bf16.vlgmr.msra.gmra.mxu1 %v57_v20 }
  0x9e   :  { %v165_v22 = vpop.f32.mrf.mxu0 }
  0x9f   :  { %v178_v23 = vpop.f32.mrf.mxu1 }
  0xa0   :  { %v179_v24 = vadd.f32 %v178_v23, %v165_v22 }
  0xa2   :  { %v192_v25 = vadd.f32 %v278_v21, %v179_v24 }
  0xa4   :  { %193 = vst [vmem:[%s359_s3] sm:$0xff] %v192_v25 }
  0xa6   :  { %v167_v26 = vpop.f32.mrf.mxu0 }
  0xa7   :  { %v180_v27 = vpop.f32.mrf.mxu1 }

</bundles_post_ra>
